<compile_context>
chip_gen: v7x
topology: tpu7x:2x2x1
jax: 0.10.0
libtpu: 0.0.40
codegen_flags: <defaults>
</compile_context>

<pallas_src>
import jax
import jax.numpy as jnp
from jax.experimental import pallas as pl
from jax.experimental.pallas import tpu as pltpu

# ---- model sizes (small, self-consistent with the module's forward) ----------
SRC_LEN = 6
TGT_LEN = 8
BATCH = 8
SRC_VOCAB = 32
TGT_VOCAB = 32
OUTPUT_SIZE = TGT_VOCAB     # `output_size` argument of Seq2Seq.forward
EMB = 16
HID = 32
FORCE_RATIO = 0.5


def _gru_gates(gi, gh, h):
    """PyTorch nn.GRUCell gate math on pre-projected inputs (gate order r, z, n)."""
    H = h.shape[1]
    r = jax.nn.sigmoid(gi[:, 0:H] + gh[:, 0:H])
    z = jax.nn.sigmoid(gi[:, H:2 * H] + gh[:, H:2 * H])
    n = jnp.tanh(gi[:, 2 * H:3 * H] + r * gh[:, 2 * H:3 * H])
    return (1.0 - z) * n + z * h


def seq2seq_kernel(force_ref,                       # SMEM (TGT_LEN,) int32
                   src_gi_ref, tgt_gi_ref,          # VMEM (S*B, 3H) / (T*B, 3H)
                   whh_e_ref, bhh_e_ref,
                   whh_d_ref, bhh_d_ref,
                   win_d_ref,                       # VMEM (TGT_VOCAB, 3H) for feedback proj
                   wout_ref, bout_ref,
                   out_ref):                        # VMEM (TGT_LEN*B, OUTPUT_SIZE)
    B, H, V = BATCH, HID, OUTPUT_SIZE

    # Hoisted broadcasts / iota (JAX does not CSE broadcast_in_dim inside loops).
    bhh_e = jnp.broadcast_to(bhh_e_ref[...], (B, 3 * H))
    bhh_d = jnp.broadcast_to(bhh_d_ref[...], (B, 3 * H))
    bout = jnp.broadcast_to(bout_ref[...], (B, V))
    col = jax.lax.broadcasted_iota(jnp.int32, (B, V), 1)

    # ---------------- encoder (input projections precomputed host-side) ------
    src_gi = src_gi_ref[...]
    whh_e = whh_e_ref[...]
    h = jnp.zeros((B, H), jnp.float32)
    for t in range(SRC_LEN):                                    # fully unrolled
        gh = jnp.dot(h, whh_e, preferred_element_type=jnp.float32) + bhh_e
        h = _gru_gates(src_gi[t * B:(t + 1) * B, :], gh, h)
    enc_state = h

    # ---------------- decoder ------------------------------------------------
    tgt_gi = tgt_gi_ref[...]
    win_d = win_d_ref[...]
    wout = wout_ref[...]
    # Hidden projection is a loop constant: the module re-feeds encoder_state.
    gh_d = jnp.dot(enc_state, whh_d_ref[...],
                   preferred_element_type=jnp.float32) + bhh_d

    gi = tgt_gi[0:B, :]          # step 0 always consumes target[0]
    logits_steps = []
    for t in range(TGT_LEN):                                    # fully unrolled
        h_t = _gru_gates(gi, gh_d, enc_state)
        logits = jnp.dot(h_t, wout, preferred_element_type=jnp.float32) + bout
        logits_steps.append(logits)

        if t < TGT_LEN - 1:      # final step's feedback is discarded by the module
            # argmax(dim=1), first-max tie-break -> one-hot -> input projection
            m = jnp.max(logits, axis=1, keepdims=True)
            best = jnp.min(jnp.where(logits >= m, col, V), axis=1, keepdims=True)
            best_oh = (col == best).astype(jnp.float32)
            fb_gi = jnp.dot(best_oh, win_d, preferred_element_type=jnp.float32)
            # register-carried select: forced input for step t+1 is target[t]
            forced = force_ref[t] != 0
            gi = jnp.where(forced, tgt_gi[t * B:(t + 1) * B, :], fb_gi)

    # single full-block store of all TGT_LEN steps (t-major row order)
    out_ref[...] = jnp.concatenate(logits_steps, axis=0)


def init_params(key):
    ks = jax.random.split(key, 12)
    s = 0.1
    return {
        "e_enc": s * jax.random.normal(ks[0], (SRC_VOCAB, EMB), jnp.float32),
        "wih_e": s * jax.random.normal(ks[1], (EMB, 3 * HID), jnp.float32),
        "whh_e": s * jax.random.normal(ks[2], (HID, 3 * HID), jnp.float32),
        "bih_e": s * jax.random.normal(ks[3], (1, 3 * HID), jnp.float32),
        "bhh_e": s * jax.random.normal(ks[4], (1, 3 * HID), jnp.float32),
        "e_dec": s * jax.random.normal(ks[5], (TGT_VOCAB, EMB), jnp.float32),
        "wih_d": s * jax.random.normal(ks[6], (EMB, 3 * HID), jnp.float32),
        "whh_d": s * jax.random.normal(ks[7], (HID, 3 * HID), jnp.float32),
        "bih_d": s * jax.random.normal(ks[8], (1, 3 * HID), jnp.float32),
        "bhh_d": s * jax.random.normal(ks[9], (1, 3 * HID), jnp.float32),
        "w_out": s * jax.random.normal(ks[10], (HID, OUTPUT_SIZE), jnp.float32),
        "b_out": s * jax.random.normal(ks[11], (1, OUTPUT_SIZE), jnp.float32),
    }


def seq2seq_forward(source_tokens, target_tokens, force_mask, params):
    """source_tokens: (SRC_LEN, B) int32, target_tokens: (TGT_LEN, B) int32,
    force_mask: (TGT_LEN,) int32. Returns (TGT_LEN, B, OUTPUT_SIZE) float32."""
    # Fold embedding + input projection (+ b_ih) into one lookup table; gather
    # the pre-projected gate inputs host-side (cheap XLA gather, overlaps launch).
    w_in_e = jnp.dot(params["e_enc"], params["wih_e"]) + params["bih_e"]
    w_in_d = jnp.dot(params["e_dec"], params["wih_d"]) + params["bih_d"]
    src_gi = jnp.take(w_in_e, source_tokens, axis=0).reshape(SRC_LEN * BATCH, 3 * HID)
    tgt_gi = jnp.take(w_in_d, target_tokens, axis=0).reshape(TGT_LEN * BATCH, 3 * HID)

    vmem = pl.BlockSpec(memory_space=pltpu.MemorySpace.VMEM)
    smem = pl.BlockSpec(memory_space=pltpu.MemorySpace.SMEM)

    args = (force_mask.astype(jnp.int32), src_gi, tgt_gi,
            params["whh_e"], params["bhh_e"],
            params["whh_d"], params["bhh_d"],
            w_in_d, params["w_out"], params["b_out"])

    out2d = pl.pallas_call(
        seq2seq_kernel,
        out_shape=jax.ShapeDtypeStruct((TGT_LEN * BATCH, OUTPUT_SIZE), jnp.float32),
        in_specs=[smem] + [vmem] * (len(args) - 1),
        out_specs=vmem,
    )(*args)

    # rows are t-major, so the PyTorch (T, B, V) layout is a plain reshape
    return out2d.reshape(TGT_LEN, BATCH, OUTPUT_SIZE)


if __name__ == "__main__":
    key = jax.random.PRNGKey(0)
    k_src, k_tgt, k_force, k_par = jax.random.split(key, 4)

    source_text = jax.random.randint(k_src, (SRC_LEN, BATCH), 0, SRC_VOCAB, dtype=jnp.int32)
    target_text = jax.random.randint(k_tgt, (TGT_LEN, BATCH), 0, TGT_VOCAB, dtype=jnp.int32)
    # deterministic stand-in for Python's random.random() < force_ratio per step
    force_mask = jax.random.bernoulli(k_force, FORCE_RATIO, (TGT_LEN,)).astype(jnp.int32)
    params = init_params(k_par)

    outputs = seq2seq_forward(source_text, target_text, force_mask, params)
    outputs = jax.block_until_ready(outputs)

    assert outputs.shape == (TGT_LEN, BATCH, OUTPUT_SIZE), outputs.shape
    assert outputs.dtype == jnp.float32
    assert bool(jnp.all(jnp.isfinite(outputs)))
    print("KERNEL_OK")
</pallas_src>

<mosaic_0001>
module attributes {stable_mosaic.version = 11 : i64} {
  func.func @seq2seq_kernel(%arg0: memref<8xi32, #tpu.memory_space<smem>>, %arg1: memref<48x96xf32, #tpu.memory_space<vmem>>, %arg2: memref<64x96xf32, #tpu.memory_space<vmem>>, %arg3: memref<32x96xf32, #tpu.memory_space<vmem>>, %arg4: memref<1x96xf32, #tpu.memory_space<vmem>>, %arg5: memref<32x96xf32, #tpu.memory_space<vmem>>, %arg6: memref<1x96xf32, #tpu.memory_space<vmem>>, %arg7: memref<32x96xf32, #tpu.memory_space<vmem>>, %arg8: memref<32x32xf32, #tpu.memory_space<vmem>>, %arg9: memref<1x32xf32, #tpu.memory_space<vmem>>, %arg10: memref<64x32xf32, #tpu.memory_space<vmem>>) attributes {dimension_semantics = [], scalar_prefetch = 0 : i64, scratch_operands = 0 : i64, tpu.core_type = #tpu.core_type<tc>} {
    %c0 = arith.constant 0 : index
    %c0_0 = arith.constant 0 : index
    %0 = vector.load %arg4[%c0, %c0_0] : memref<1x96xf32, #tpu.memory_space<vmem>>, vector<1x96xf32>
    %1 = vector.shape_cast %0 : vector<1x96xf32> to vector<1x96xf32>
    %2 = vector.broadcast %1 : vector<1x96xf32> to vector<8x96xf32>
    %c0_1 = arith.constant 0 : index
    %c0_2 = arith.constant 0 : index
    %3 = vector.load %arg6[%c0_1, %c0_2] : memref<1x96xf32, #tpu.memory_space<vmem>>, vector<1x96xf32>
    %4 = vector.shape_cast %3 : vector<1x96xf32> to vector<1x96xf32>
    %5 = vector.broadcast %4 : vector<1x96xf32> to vector<8x96xf32>
    %c0_3 = arith.constant 0 : index
    %c0_4 = arith.constant 0 : index
    %6 = vector.load %arg9[%c0_3, %c0_4] : memref<1x32xf32, #tpu.memory_space<vmem>>, vector<1x32xf32>
    %7 = vector.shape_cast %6 : vector<1x32xf32> to vector<1x32xf32>
    %8 = vector.broadcast %7 : vector<1x32xf32> to vector<8x32xf32>
    %9 = tpu.iota {dimensions = array<i32: 1>} : vector<8x32xi32>
    %c0_5 = arith.constant 0 : index
    %c0_6 = arith.constant 0 : index
    %10 = vector.load %arg1[%c0_5, %c0_6] : memref<48x96xf32, #tpu.memory_space<vmem>>, vector<48x96xf32>
    %c0_7 = arith.constant 0 : index
    %c0_8 = arith.constant 0 : index
    %11 = vector.load %arg3[%c0_7, %c0_8] : memref<32x96xf32, #tpu.memory_space<vmem>>, vector<32x96xf32>
    %cst = arith.constant 0.000000e+00 : f32
    %12 = vector.broadcast %cst : f32 to vector<8x32xf32>
    %cst_9 = arith.constant dense<0.000000e+00> : vector<8x96xf32>
    %13 = tpu.matmul %12, %11, %cst_9 {dimension_numbers = #tpu.dot_dimension_numbers<[1], [0], [0], [1], [0, 0, 1, 1], [], []>} : vector<8x32xf32>, vector<32x96xf32>, vector<8x96xf32> -> vector<8x96xf32>
    %14 = arith.addf %13, %2 : vector<8x96xf32>
    %15 = vector.extract_strided_slice %10 {offsets = [0, 0], sizes = [8, 96], strides = [1, 1]} : vector<48x96xf32> to vector<8x96xf32>
    %16 = vector.extract_strided_slice %15 {offsets = [0, 0], sizes = [8, 32], strides = [1, 1]} : vector<8x96xf32> to vector<8x32xf32>
    %17 = vector.extract_strided_slice %14 {offsets = [0, 0], sizes = [8, 32], strides = [1, 1]} : vector<8x96xf32> to vector<8x32xf32>
    %18 = arith.addf %16, %17 : vector<8x32xf32>
    %19 = arith.negf %18 : vector<8x32xf32>
    %20 = math.exp %19 : vector<8x32xf32>
    %cst_10 = arith.constant 1.000000e+00 : f32
    %21 = vector.broadcast %cst_10 : f32 to vector<8x32xf32>
    %22 = arith.addf %21, %20 : vector<8x32xf32>
    %23 = arith.divf %21, %22 : vector<8x32xf32>
    %24 = vector.extract_strided_slice %15 {offsets = [0, 32], sizes = [8, 32], strides = [1, 1]} : vector<8x96xf32> to vector<8x32xf32>
    %25 = vector.extract_strided_slice %14 {offsets = [0, 32], sizes = [8, 32], strides = [1, 1]} : vector<8x96xf32> to vector<8x32xf32>
    %26 = arith.addf %24, %25 : vector<8x32xf32>
    %27 = arith.negf %26 : vector<8x32xf32>
    %28 = math.exp %27 : vector<8x32xf32>
    %cst_11 = arith.constant 1.000000e+00 : f32
    %29 = vector.broadcast %cst_11 : f32 to vector<8x32xf32>
    %30 = arith.addf %29, %28 : vector<8x32xf32>
    %31 = arith.divf %29, %30 : vector<8x32xf32>
    %32 = vector.extract_strided_slice %15 {offsets = [0, 64], sizes = [8, 32], strides = [1, 1]} : vector<8x96xf32> to vector<8x32xf32>
    %33 = vector.extract_strided_slice %14 {offsets = [0, 64], sizes = [8, 32], strides = [1, 1]} : vector<8x96xf32> to vector<8x32xf32>
    %34 = arith.mulf %23, %33 : vector<8x32xf32>
    %35 = arith.addf %32, %34 : vector<8x32xf32>
    %36 = math.tanh %35 : vector<8x32xf32>
    %cst_12 = arith.constant 1.000000e+00 : f32
    %37 = vector.broadcast %cst_12 : f32 to vector<8x32xf32>
    %38 = arith.subf %37, %31 : vector<8x32xf32>
    %39 = arith.mulf %38, %36 : vector<8x32xf32>
    %40 = arith.mulf %31, %12 : vector<8x32xf32>
    %41 = arith.addf %39, %40 : vector<8x32xf32>
    %cst_13 = arith.constant dense<0.000000e+00> : vector<8x96xf32>
    %42 = tpu.matmul %41, %11, %cst_13 {dimension_numbers = #tpu.dot_dimension_numbers<[1], [0], [0], [1], [0, 0, 1, 1], [], []>} : vector<8x32xf32>, vector<32x96xf32>, vector<8x96xf32> -> vector<8x96xf32>
    %43 = arith.addf %42, %2 : vector<8x96xf32>
    %44 = vector.extract_strided_slice %10 {offsets = [8, 0], sizes = [8, 96], strides = [1, 1]} : vector<48x96xf32> to vector<8x96xf32>
    %45 = vector.extract_strided_slice %44 {offsets = [0, 0], sizes = [8, 32], strides = [1, 1]} : vector<8x96xf32> to vector<8x32xf32>
    %46 = vector.extract_strided_slice %43 {offsets = [0, 0], sizes = [8, 32], strides = [1, 1]} : vector<8x96xf32> to vector<8x32xf32>
    %47 = arith.addf %45, %46 : vector<8x32xf32>
    %48 = arith.negf %47 : vector<8x32xf32>
    %49 = math.exp %48 : vector<8x32xf32>
    %cst_14 = arith.constant 1.000000e+00 : f32
    %50 = vector.broadcast %cst_14 : f32 to vector<8x32xf32>
    %51 = arith.addf %50, %49 : vector<8x32xf32>
    %52 = arith.divf %50, %51 : vector<8x32xf32>
    %53 = vector.extract_strided_slice %44 {offsets = [0, 32], sizes = [8, 32], strides = [1, 1]} : vector<8x96xf32> to vector<8x32xf32>
    %54 = vector.extract_strided_slice %43 {offsets = [0, 32], sizes = [8, 32], strides = [1, 1]} : vector<8x96xf32> to vector<8x32xf32>
    %55 = arith.addf %53, %54 : vector<8x32xf32>
    %56 = arith.negf %55 : vector<8x32xf32>
    %57 = math.exp %56 : vector<8x32xf32>
    %cst_15 = arith.constant 1.000000e+00 : f32
    %58 = vector.broadcast %cst_15 : f32 to vector<8x32xf32>
    %59 = arith.addf %58, %57 : vector<8x32xf32>
    %60 = arith.divf %58, %59 : vector<8x32xf32>
    %61 = vector.extract_strided_slice %44 {offsets = [0, 64], sizes = [8, 32], strides = [1, 1]} : vector<8x96xf32> to vector<8x32xf32>
    %62 = vector.extract_strided_slice %43 {offsets = [0, 64], sizes = [8, 32], strides = [1, 1]} : vector<8x96xf32> to vector<8x32xf32>
    %63 = arith.mulf %52, %62 : vector<8x32xf32>
    %64 = arith.addf %61, %63 : vector<8x32xf32>
    %65 = math.tanh %64 : vector<8x32xf32>
    %cst_16 = arith.constant 1.000000e+00 : f32
    %66 = vector.broadcast %cst_16 : f32 to vector<8x32xf32>
    %67 = arith.subf %66, %60 : vector<8x32xf32>
    %68 = arith.mulf %67, %65 : vector<8x32xf32>
    %69 = arith.mulf %60, %41 : vector<8x32xf32>
    %70 = arith.addf %68, %69 : vector<8x32xf32>
    %cst_17 = arith.constant dense<0.000000e+00> : vector<8x96xf32>
    %71 = tpu.matmul %70, %11, %cst_17 {dimension_numbers = #tpu.dot_dimension_numbers<[1], [0], [0], [1], [0, 0, 1, 1], [], []>} : vector<8x32xf32>, vector<32x96xf32>, vector<8x96xf32> -> vector<8x96xf32>
    %72 = arith.addf %71, %2 : vector<8x96xf32>
    %73 = vector.extract_strided_slice %10 {offsets = [16, 0], sizes = [8, 96], strides = [1, 1]} : vector<48x96xf32> to vector<8x96xf32>
    %74 = vector.extract_strided_slice %73 {offsets = [0, 0], sizes = [8, 32], strides = [1, 1]} : vector<8x96xf32> to vector<8x32xf32>
    %75 = vector.extract_strided_slice %72 {offsets = [0, 0], sizes = [8, 32], strides = [1, 1]} : vector<8x96xf32> to vector<8x32xf32>
    %76 = arith.addf %74, %75 : vector<8x32xf32>
    %77 = arith.negf %76 : vector<8x32xf32>
    %78 = math.exp %77 : vector<8x32xf32>
    %cst_18 = arith.constant 1.000000e+00 : f32
    %79 = vector.broadcast %cst_18 : f32 to vector<8x32xf32>
    %80 = arith.addf %79, %78 : vector<8x32xf32>
    %81 = arith.divf %79, %80 : vector<8x32xf32>
    %82 = vector.extract_strided_slice %73 {offsets = [0, 32], sizes = [8, 32], strides = [1, 1]} : vector<8x96xf32> to vector<8x32xf32>
    %83 = vector.extract_strided_slice %72 {offsets = [0, 32], sizes = [8, 32], strides = [1, 1]} : vector<8x96xf32> to vector<8x32xf32>
    %84 = arith.addf %82, %83 : vector<8x32xf32>
    %85 = arith.negf %84 : vector<8x32xf32>
    %86 = math.exp %85 : vector<8x32xf32>
    %cst_19 = arith.constant 1.000000e+00 : f32
    %87 = vector.broadcast %cst_19 : f32 to vector<8x32xf32>
    %88 = arith.addf %87, %86 : vector<8x32xf32>
    %89 = arith.divf %87, %88 : vector<8x32xf32>
    %90 = vector.extract_strided_slice %73 {offsets = [0, 64], sizes = [8, 32], strides = [1, 1]} : vector<8x96xf32> to vector<8x32xf32>
    %91 = vector.extract_strided_slice %72 {offsets = [0, 64], sizes = [8, 32], strides = [1, 1]} : vector<8x96xf32> to vector<8x32xf32>
    %92 = arith.mulf %81, %91 : vector<8x32xf32>
    %93 = arith.addf %90, %92 : vector<8x32xf32>
    %94 = math.tanh %93 : vector<8x32xf32>
    %cst_20 = arith.constant 1.000000e+00 : f32
    %95 = vector.broadcast %cst_20 : f32 to vector<8x32xf32>
    %96 = arith.subf %95, %89 : vector<8x32xf32>
    %97 = arith.mulf %96, %94 : vector<8x32xf32>
    %98 = arith.mulf %89, %70 : vector<8x32xf32>
    %99 = arith.addf %97, %98 : vector<8x32xf32>
    %cst_21 = arith.constant dense<0.000000e+00> : vector<8x96xf32>
    %100 = tpu.matmul %99, %11, %cst_21 {dimension_numbers = #tpu.dot_dimension_numbers<[1], [0], [0], [1], [0, 0, 1, 1], [], []>} : vector<8x32xf32>, vector<32x96xf32>, vector<8x96xf32> -> vector<8x96xf32>
    %101 = arith.addf %100, %2 : vector<8x96xf32>
    %102 = vector.extract_strided_slice %10 {offsets = [24, 0], sizes = [8, 96], strides = [1, 1]} : vector<48x96xf32> to vector<8x96xf32>
    %103 = vector.extract_strided_slice %102 {offsets = [0, 0], sizes = [8, 32], strides = [1, 1]} : vector<8x96xf32> to vector<8x32xf32>
    %104 = vector.extract_strided_slice %101 {offsets = [0, 0], sizes = [8, 32], strides = [1, 1]} : vector<8x96xf32> to vector<8x32xf32>
    %105 = arith.addf %103, %104 : vector<8x32xf32>
    %106 = arith.negf %105 : vector<8x32xf32>
    %107 = math.exp %106 : vector<8x32xf32>
    %cst_22 = arith.constant 1.000000e+00 : f32
    %108 = vector.broadcast %cst_22 : f32 to vector<8x32xf32>
    %109 = arith.addf %108, %107 : vector<8x32xf32>
    %110 = arith.divf %108, %109 : vector<8x32xf32>
    %111 = vector.extract_strided_slice %102 {offsets = [0, 32], sizes = [8, 32], strides = [1, 1]} : vector<8x96xf32> to vector<8x32xf32>
    %112 = vector.extract_strided_slice %101 {offsets = [0, 32], sizes = [8, 32], strides = [1, 1]} : vector<8x96xf32> to vector<8x32xf32>
    %113 = arith.addf %111, %112 : vector<8x32xf32>
    %114 = arith.negf %113 : vector<8x32xf32>
    %115 = math.exp %114 : vector<8x32xf32>
    %cst_23 = arith.constant 1.000000e+00 : f32
    %116 = vector.broadcast %cst_23 : f32 to vector<8x32xf32>
    %117 = arith.addf %116, %115 : vector<8x32xf32>
    %118 = arith.divf %116, %117 : vector<8x32xf32>
    %119 = vector.extract_strided_slice %102 {offsets = [0, 64], sizes = [8, 32], strides = [1, 1]} : vector<8x96xf32> to vector<8x32xf32>
    %120 = vector.extract_strided_slice %101 {offsets = [0, 64], sizes = [8, 32], strides = [1, 1]} : vector<8x96xf32> to vector<8x32xf32>
    %121 = arith.mulf %110, %120 : vector<8x32xf32>
    %122 = arith.addf %119, %121 : vector<8x32xf32>
    %123 = math.tanh %122 : vector<8x32xf32>
    %cst_24 = arith.constant 1.000000e+00 : f32
    %124 = vector.broadcast %cst_24 : f32 to vector<8x32xf32>
    %125 = arith.subf %124, %118 : vector<8x32xf32>
    %126 = arith.mulf %125, %123 : vector<8x32xf32>
    %127 = arith.mulf %118, %99 : vector<8x32xf32>
    %128 = arith.addf %126, %127 : vector<8x32xf32>
    %cst_25 = arith.constant dense<0.000000e+00> : vector<8x96xf32>
    %129 = tpu.matmul %128, %11, %cst_25 {dimension_numbers = #tpu.dot_dimension_numbers<[1], [0], [0], [1], [0, 0, 1, 1], [], []>} : vector<8x32xf32>, vector<32x96xf32>, vector<8x96xf32> -> vector<8x96xf32>
    %130 = arith.addf %129, %2 : vector<8x96xf32>
    %131 = vector.extract_strided_slice %10 {offsets = [32, 0], sizes = [8, 96], strides = [1, 1]} : vector<48x96xf32> to vector<8x96xf32>
    %132 = vector.extract_strided_slice %131 {offsets = [0, 0], sizes = [8, 32], strides = [1, 1]} : vector<8x96xf32> to vector<8x32xf32>
    %133 = vector.extract_strided_slice %130 {offsets = [0, 0], sizes = [8, 32], strides = [1, 1]} : vector<8x96xf32> to vector<8x32xf32>
    %134 = arith.addf %132, %133 : vector<8x32xf32>
    %135 = arith.negf %134 : vector<8x32xf32>
    %136 = math.exp %135 : vector<8x32xf32>
    %cst_26 = arith.constant 1.000000e+00 : f32
    %137 = vector.broadcast %cst_26 : f32 to vector<8x32xf32>
    %138 = arith.addf %137, %136 : vector<8x32xf32>
    %139 = arith.divf %137, %138 : vector<8x32xf32>
    %140 = vector.extract_strided_slice %131 {offsets = [0, 32], sizes = [8, 32], strides = [1, 1]} : vector<8x96xf32> to vector<8x32xf32>
    %141 = vector.extract_strided_slice %130 {offsets = [0, 32], sizes = [8, 32], strides = [1, 1]} : vector<8x96xf32> to vector<8x32xf32>
    %142 = arith.addf %140, %141 : vector<8x32xf32>
    %143 = arith.negf %142 : vector<8x32xf32>
    %144 = math.exp %143 : vector<8x32xf32>
    %cst_27 = arith.constant 1.000000e+00 : f32
    %145 = vector.broadcast %cst_27 : f32 to vector<8x32xf32>
    %146 = arith.addf %145, %144 : vector<8x32xf32>
    %147 = arith.divf %145, %146 : vector<8x32xf32>
    %148 = vector.extract_strided_slice %131 {offsets = [0, 64], sizes = [8, 32], strides = [1, 1]} : vector<8x96xf32> to vector<8x32xf32>
    %149 = vector.extract_strided_slice %130 {offsets = [0, 64], sizes = [8, 32], strides = [1, 1]} : vector<8x96xf32> to vector<8x32xf32>
    %150 = arith.mulf %139, %149 : vector<8x32xf32>
    %151 = arith.addf %148, %150 : vector<8x32xf32>
    %152 = math.tanh %151 : vector<8x32xf32>
    %cst_28 = arith.constant 1.000000e+00 : f32
    %153 = vector.broadcast %cst_28 : f32 to vector<8x32xf32>
    %154 = arith.subf %153, %147 : vector<8x32xf32>
    %155 = arith.mulf %154, %152 : vector<8x32xf32>
    %156 = arith.mulf %147, %128 : vector<8x32xf32>
    %157 = arith.addf %155, %156 : vector<8x32xf32>
    %cst_29 = arith.constant dense<0.000000e+00> : vector<8x96xf32>
    %158 = tpu.matmul %157, %11, %cst_29 {dimension_numbers = #tpu.dot_dimension_numbers<[1], [0], [0], [1], [0, 0, 1, 1], [], []>} : vector<8x32xf32>, vector<32x96xf32>, vector<8x96xf32> -> vector<8x96xf32>
    %159 = arith.addf %158, %2 : vector<8x96xf32>
    %160 = vector.extract_strided_slice %10 {offsets = [40, 0], sizes = [8, 96], strides = [1, 1]} : vector<48x96xf32> to vector<8x96xf32>
    %161 = vector.extract_strided_slice %160 {offsets = [0, 0], sizes = [8, 32], strides = [1, 1]} : vector<8x96xf32> to vector<8x32xf32>
    %162 = vector.extract_strided_slice %159 {offsets = [0, 0], sizes = [8, 32], strides = [1, 1]} : vector<8x96xf32> to vector<8x32xf32>
    %163 = arith.addf %161, %162 : vector<8x32xf32>
    %164 = arith.negf %163 : vector<8x32xf32>
    %165 = math.exp %164 : vector<8x32xf32>
    %cst_30 = arith.constant 1.000000e+00 : f32
    %166 = vector.broadcast %cst_30 : f32 to vector<8x32xf32>
    %167 = arith.addf %166, %165 : vector<8x32xf32>
    %168 = arith.divf %166, %167 : vector<8x32xf32>
    %169 = vector.extract_strided_slice %160 {offsets = [0, 32], sizes = [8, 32], strides = [1, 1]} : vector<8x96xf32> to vector<8x32xf32>
    %170 = vector.extract_strided_slice %159 {offsets = [0, 32], sizes = [8, 32], strides = [1, 1]} : vector<8x96xf32> to vector<8x32xf32>
    %171 = arith.addf %169, %170 : vector<8x32xf32>
    %172 = arith.negf %171 : vector<8x32xf32>
    %173 = math.exp %172 : vector<8x32xf32>
    %cst_31 = arith.constant 1.000000e+00 : f32
    %174 = vector.broadcast %cst_31 : f32 to vector<8x32xf32>
    %175 = arith.addf %174, %173 : vector<8x32xf32>
    %176 = arith.divf %174, %175 : vector<8x32xf32>
    %177 = vector.extract_strided_slice %160 {offsets = [0, 64], sizes = [8, 32], strides = [1, 1]} : vector<8x96xf32> to vector<8x32xf32>
    %178 = vector.extract_strided_slice %159 {offsets = [0, 64], sizes = [8, 32], strides = [1, 1]} : vector<8x96xf32> to vector<8x32xf32>
    %179 = arith.mulf %168, %178 : vector<8x32xf32>
    %180 = arith.addf %177, %179 : vector<8x32xf32>
    %181 = math.tanh %180 : vector<8x32xf32>
    %cst_32 = arith.constant 1.000000e+00 : f32
    %182 = vector.broadcast %cst_32 : f32 to vector<8x32xf32>
    %183 = arith.subf %182, %176 : vector<8x32xf32>
    %184 = arith.mulf %183, %181 : vector<8x32xf32>
    %185 = arith.mulf %176, %157 : vector<8x32xf32>
    %186 = arith.addf %184, %185 : vector<8x32xf32>
    %c0_33 = arith.constant 0 : index
    %c0_34 = arith.constant 0 : index
    %187 = vector.load %arg2[%c0_33, %c0_34] : memref<64x96xf32, #tpu.memory_space<vmem>>, vector<64x96xf32>
    %c0_35 = arith.constant 0 : index
    %c0_36 = arith.constant 0 : index
    %188 = vector.load %arg7[%c0_35, %c0_36] : memref<32x96xf32, #tpu.memory_space<vmem>>, vector<32x96xf32>
    %c0_37 = arith.constant 0 : index
    %c0_38 = arith.constant 0 : index
    %189 = vector.load %arg8[%c0_37, %c0_38] : memref<32x32xf32, #tpu.memory_space<vmem>>, vector<32x32xf32>
    %c0_39 = arith.constant 0 : index
    %c0_40 = arith.constant 0 : index
    %190 = vector.load %arg5[%c0_39, %c0_40] : memref<32x96xf32, #tpu.memory_space<vmem>>, vector<32x96xf32>
    %cst_41 = arith.constant dense<0.000000e+00> : vector<8x96xf32>
    %191 = tpu.matmul %186, %190, %cst_41 {dimension_numbers = #tpu.dot_dimension_numbers<[1], [0], [0], [1], [0, 0, 1, 1], [], []>} : vector<8x32xf32>, vector<32x96xf32>, vector<8x96xf32> -> vector<8x96xf32>
    %192 = arith.addf %191, %5 : vector<8x96xf32>
    %193 = vector.extract_strided_slice %187 {offsets = [0, 0], sizes = [8, 96], strides = [1, 1]} : vector<64x96xf32> to vector<8x96xf32>
    %194 = vector.extract_strided_slice %193 {offsets = [0, 0], sizes = [8, 32], strides = [1, 1]} : vector<8x96xf32> to vector<8x32xf32>
    %195 = vector.extract_strided_slice %192 {offsets = [0, 0], sizes = [8, 32], strides = [1, 1]} : vector<8x96xf32> to vector<8x32xf32>
    %196 = arith.addf %194, %195 : vector<8x32xf32>
    %197 = arith.negf %196 : vector<8x32xf32>
    %198 = math.exp %197 : vector<8x32xf32>
    %cst_42 = arith.constant 1.000000e+00 : f32
    %199 = vector.broadcast %cst_42 : f32 to vector<8x32xf32>
    %200 = arith.addf %199, %198 : vector<8x32xf32>
    %201 = arith.divf %199, %200 : vector<8x32xf32>
    %202 = vector.extract_strided_slice %193 {offsets = [0, 32], sizes = [8, 32], strides = [1, 1]} : vector<8x96xf32> to vector<8x32xf32>
    %203 = vector.extract_strided_slice %192 {offsets = [0, 32], sizes = [8, 32], strides = [1, 1]} : vector<8x96xf32> to vector<8x32xf32>
    %204 = arith.addf %202, %203 : vector<8x32xf32>
    %205 = arith.negf %204 : vector<8x32xf32>
    %206 = math.exp %205 : vector<8x32xf32>
    %cst_43 = arith.constant 1.000000e+00 : f32
    %207 = vector.broadcast %cst_43 : f32 to vector<8x32xf32>
    %208 = arith.addf %207, %206 : vector<8x32xf32>
    %209 = arith.divf %207, %208 : vector<8x32xf32>
    %210 = vector.extract_strided_slice %193 {offsets = [0, 64], sizes = [8, 32], strides = [1, 1]} : vector<8x96xf32> to vector<8x32xf32>
    %211 = vector.extract_strided_slice %192 {offsets = [0, 64], sizes = [8, 32], strides = [1, 1]} : vector<8x96xf32> to vector<8x32xf32>
    %212 = arith.mulf %201, %211 : vector<8x32xf32>
    %213 = arith.addf %210, %212 : vector<8x32xf32>
    %214 = math.tanh %213 : vector<8x32xf32>
    %cst_44 = arith.constant 1.000000e+00 : f32
    %215 = vector.broadcast %cst_44 : f32 to vector<8x32xf32>
    %216 = arith.subf %215, %209 : vector<8x32xf32>
    %217 = arith.mulf %216, %214 : vector<8x32xf32>
    %218 = arith.mulf %209, %186 : vector<8x32xf32>
    %219 = arith.addf %217, %218 : vector<8x32xf32>
    %cst_45 = arith.constant dense<0.000000e+00> : vector<8x32xf32>
    %220 = tpu.matmul %219, %189, %cst_45 {dimension_numbers = #tpu.dot_dimension_numbers<[1], [0], [0], [1], [0, 0, 1, 1], [], []>} : vector<8x32xf32>, vector<32x32xf32>, vector<8x32xf32> -> vector<8x32xf32>
    %221 = arith.addf %220, %8 : vector<8x32xf32>
    %cst_46 = arith.constant dense<0xFF800000> : vector<8xf32>
    %222 = vector.multi_reduction <maximumf>, %221, %cst_46 [1] : vector<8x32xf32> to vector<8xf32>
    %223 = vector.shape_cast %222 : vector<8xf32> to vector<8x1xf32>
    %224 = vector.broadcast %223 : vector<8x1xf32> to vector<8x32xf32>
    %225 = arith.cmpf oge, %221, %224 : vector<8x32xf32>
    %c32_i32 = arith.constant 32 : i32
    %226 = vector.broadcast %c32_i32 : i32 to vector<8x32xi32>
    %227 = arith.select %225, %9, %226 : vector<8x32xi1>, vector<8x32xi32>
    %cst_47 = arith.constant dense<2147483647> : vector<8xi32>
    %228 = vector.multi_reduction <minsi>, %227, %cst_47 [1] : vector<8x32xi32> to vector<8xi32>
    %229 = vector.shape_cast %228 : vector<8xi32> to vector<8x1xi32>
    %230 = vector.broadcast %229 : vector<8x1xi32> to vector<8x32xi32>
    %231 = arith.cmpi eq, %9, %230 : vector<8x32xi32>
    %232 = arith.extui %231 : vector<8x32xi1> to vector<8x32xi32>
    %233 = arith.sitofp %232 : vector<8x32xi32> to vector<8x32xf32>
    %cst_48 = arith.constant dense<0.000000e+00> : vector<8x96xf32>
    %234 = tpu.matmul %233, %188, %cst_48 {dimension_numbers = #tpu.dot_dimension_numbers<[1], [0], [0], [1], [0, 0, 1, 1], [], []>} : vector<8x32xf32>, vector<32x96xf32>, vector<8x96xf32> -> vector<8x96xf32>
    %c0_49 = arith.constant 0 : index
    %235 = memref.load %arg0[%c0_49] : memref<8xi32, #tpu.memory_space<smem>>
    %c0_i32 = arith.constant 0 : i32
    %236 = arith.cmpi ne, %235, %c0_i32 : i32
    %237 = vector.extract_strided_slice %187 {offsets = [0, 0], sizes = [8, 96], strides = [1, 1]} : vector<64x96xf32> to vector<8x96xf32>
    %238 = arith.select %236, %237, %234 : vector<8x96xf32>
    %239 = vector.extract_strided_slice %238 {offsets = [0, 0], sizes = [8, 32], strides = [1, 1]} : vector<8x96xf32> to vector<8x32xf32>
    %240 = vector.extract_strided_slice %192 {offsets = [0, 0], sizes = [8, 32], strides = [1, 1]} : vector<8x96xf32> to vector<8x32xf32>
    %241 = arith.addf %239, %240 : vector<8x32xf32>
    %242 = arith.negf %241 : vector<8x32xf32>
    %243 = math.exp %242 : vector<8x32xf32>
    %cst_50 = arith.constant 1.000000e+00 : f32
    %244 = vector.broadcast %cst_50 : f32 to vector<8x32xf32>
    %245 = arith.addf %244, %243 : vector<8x32xf32>
    %246 = arith.divf %244, %245 : vector<8x32xf32>
    %247 = vector.extract_strided_slice %238 {offsets = [0, 32], sizes = [8, 32], strides = [1, 1]} : vector<8x96xf32> to vector<8x32xf32>
    %248 = vector.extract_strided_slice %192 {offsets = [0, 32], sizes = [8, 32], strides = [1, 1]} : vector<8x96xf32> to vector<8x32xf32>
    %249 = arith.addf %247, %248 : vector<8x32xf32>
    %250 = arith.negf %249 : vector<8x32xf32>
    %251 = math.exp %250 : vector<8x32xf32>
    %cst_51 = arith.constant 1.000000e+00 : f32
    %252 = vector.broadcast %cst_51 : f32 to vector<8x32xf32>
    %253 = arith.addf %252, %251 : vector<8x32xf32>
    %254 = arith.divf %252, %253 : vector<8x32xf32>
    %255 = vector.extract_strided_slice %238 {offsets = [0, 64], sizes = [8, 32], strides = [1, 1]} : vector<8x96xf32> to vector<8x32xf32>
    %256 = vector.extract_strided_slice %192 {offsets = [0, 64], sizes = [8, 32], strides = [1, 1]} : vector<8x96xf32> to vector<8x32xf32>
    %257 = arith.mulf %246, %256 : vector<8x32xf32>
    %258 = arith.addf %255, %257 : vector<8x32xf32>
    %259 = math.tanh %258 : vector<8x32xf32>
    %cst_52 = arith.constant 1.000000e+00 : f32
    %260 = vector.broadcast %cst_52 : f32 to vector<8x32xf32>
    %261 = arith.subf %260, %254 : vector<8x32xf32>
    %262 = arith.mulf %261, %259 : vector<8x32xf32>
    %263 = arith.mulf %254, %186 : vector<8x32xf32>
    %264 = arith.addf %262, %263 : vector<8x32xf32>
    %cst_53 = arith.constant dense<0.000000e+00> : vector<8x32xf32>
    %265 = tpu.matmul %264, %189, %cst_53 {dimension_numbers = #tpu.dot_dimension_numbers<[1], [0], [0], [1], [0, 0, 1, 1], [], []>} : vector<8x32xf32>, vector<32x32xf32>, vector<8x32xf32> -> vector<8x32xf32>
    %266 = arith.addf %265, %8 : vector<8x32xf32>
    %cst_54 = arith.constant dense<0xFF800000> : vector<8xf32>
    %267 = vector.multi_reduction <maximumf>, %266, %cst_54 [1] : vector<8x32xf32> to vector<8xf32>
    %268 = vector.shape_cast %267 : vector<8xf32> to vector<8x1xf32>
    %269 = vector.broadcast %268 : vector<8x1xf32> to vector<8x32xf32>
    %270 = arith.cmpf oge, %266, %269 : vector<8x32xf32>
    %c32_i32_55 = arith.constant 32 : i32
    %271 = vector.broadcast %c32_i32_55 : i32 to vector<8x32xi32>
    %272 = arith.select %270, %9, %271 : vector<8x32xi1>, vector<8x32xi32>
    %cst_56 = arith.constant dense<2147483647> : vector<8xi32>
    %273 = vector.multi_reduction <minsi>, %272, %cst_56 [1] : vector<8x32xi32> to vector<8xi32>
    %274 = vector.shape_cast %273 : vector<8xi32> to vector<8x1xi32>
    %275 = vector.broadcast %274 : vector<8x1xi32> to vector<8x32xi32>
    %276 = arith.cmpi eq, %9, %275 : vector<8x32xi32>
    %277 = arith.extui %276 : vector<8x32xi1> to vector<8x32xi32>
    %278 = arith.sitofp %277 : vector<8x32xi32> to vector<8x32xf32>
    %cst_57 = arith.constant dense<0.000000e+00> : vector<8x96xf32>
    %279 = tpu.matmul %278, %188, %cst_57 {dimension_numbers = #tpu.dot_dimension_numbers<[1], [0], [0], [1], [0, 0, 1, 1], [], []>} : vector<8x32xf32>, vector<32x96xf32>, vector<8x96xf32> -> vector<8x96xf32>
    %c1 = arith.constant 1 : index
    %280 = memref.load %arg0[%c1] : memref<8xi32, #tpu.memory_space<smem>>
    %c0_i32_58 = arith.constant 0 : i32
    %281 = arith.cmpi ne, %280, %c0_i32_58 : i32
    %282 = vector.extract_strided_slice %187 {offsets = [8, 0], sizes = [8, 96], strides = [1, 1]} : vector<64x96xf32> to vector<8x96xf32>
    %283 = arith.select %281, %282, %279 : vector<8x96xf32>
    %284 = vector.extract_strided_slice %283 {offsets = [0, 0], sizes = [8, 32], strides = [1, 1]} : vector<8x96xf32> to vector<8x32xf32>
    %285 = vector.extract_strided_slice %192 {offsets = [0, 0], sizes = [8, 32], strides = [1, 1]} : vector<8x96xf32> to vector<8x32xf32>
    %286 = arith.addf %284, %285 : vector<8x32xf32>
    %287 = arith.negf %286 : vector<8x32xf32>
    %288 = math.exp %287 : vector<8x32xf32>
    %cst_59 = arith.constant 1.000000e+00 : f32
    %289 = vector.broadcast %cst_59 : f32 to vector<8x32xf32>
    %290 = arith.addf %289, %288 : vector<8x32xf32>
    %291 = arith.divf %289, %290 : vector<8x32xf32>
    %292 = vector.extract_strided_slice %283 {offsets = [0, 32], sizes = [8, 32], strides = [1, 1]} : vector<8x96xf32> to vector<8x32xf32>
    %293 = vector.extract_strided_slice %192 {offsets = [0, 32], sizes = [8, 32], strides = [1, 1]} : vector<8x96xf32> to vector<8x32xf32>
    %294 = arith.addf %292, %293 : vector<8x32xf32>
    %295 = arith.negf %294 : vector<8x32xf32>
    %296 = math.exp %295 : vector<8x32xf32>
    %cst_60 = arith.constant 1.000000e+00 : f32
    %297 = vector.broadcast %cst_60 : f32 to vector<8x32xf32>
    %298 = arith.addf %297, %296 : vector<8x32xf32>
    %299 = arith.divf %297, %298 : vector<8x32xf32>
    %300 = vector.extract_strided_slice %283 {offsets = [0, 64], sizes = [8, 32], strides = [1, 1]} : vector<8x96xf32> to vector<8x32xf32>
    %301 = vector.extract_strided_slice %192 {offsets = [0, 64], sizes = [8, 32], strides = [1, 1]} : vector<8x96xf32> to vector<8x32xf32>
    %302 = arith.mulf %291, %301 : vector<8x32xf32>
    %303 = arith.addf %300, %302 : vector<8x32xf32>
    %304 = math.tanh %303 : vector<8x32xf32>
    %cst_61 = arith.constant 1.000000e+00 : f32
    %305 = vector.broadcast %cst_61 : f32 to vector<8x32xf32>
    %306 = arith.subf %305, %299 : vector<8x32xf32>
    %307 = arith.mulf %306, %304 : vector<8x32xf32>
    %308 = arith.mulf %299, %186 : vector<8x32xf32>
    %309 = arith.addf %307, %308 : vector<8x32xf32>
    %cst_62 = arith.constant dense<0.000000e+00> : vector<8x32xf32>
    %310 = tpu.matmul %309, %189, %cst_62 {dimension_numbers = #tpu.dot_dimension_numbers<[1], [0], [0], [1], [0, 0, 1, 1], [], []>} : vector<8x32xf32>, vector<32x32xf32>, vector<8x32xf32> -> vector<8x32xf32>
    %311 = arith.addf %310, %8 : vector<8x32xf32>
    %cst_63 = arith.constant dense<0xFF800000> : vector<8xf32>
    %312 = vector.multi_reduction <maximumf>, %311, %cst_63 [1] : vector<8x32xf32> to vector<8xf32>
    %313 = vector.shape_cast %312 : vector<8xf32> to vector<8x1xf32>
    %314 = vector.broadcast %313 : vector<8x1xf32> to vector<8x32xf32>
    %315 = arith.cmpf oge, %311, %314 : vector<8x32xf32>
    %c32_i32_64 = arith.constant 32 : i32
    %316 = vector.broadcast %c32_i32_64 : i32 to vector<8x32xi32>
    %317 = arith.select %315, %9, %316 : vector<8x32xi1>, vector<8x32xi32>
    %cst_65 = arith.constant dense<2147483647> : vector<8xi32>
    %318 = vector.multi_reduction <minsi>, %317, %cst_65 [1] : vector<8x32xi32> to vector<8xi32>
    %319 = vector.shape_cast %318 : vector<8xi32> to vector<8x1xi32>
    %320 = vector.broadcast %319 : vector<8x1xi32> to vector<8x32xi32>
    %321 = arith.cmpi eq, %9, %320 : vector<8x32xi32>
    %322 = arith.extui %321 : vector<8x32xi1> to vector<8x32xi32>
    %323 = arith.sitofp %322 : vector<8x32xi32> to vector<8x32xf32>
    %cst_66 = arith.constant dense<0.000000e+00> : vector<8x96xf32>
    %324 = tpu.matmul %323, %188, %cst_66 {dimension_numbers = #tpu.dot_dimension_numbers<[1], [0], [0], [1], [0, 0, 1, 1], [], []>} : vector<8x32xf32>, vector<32x96xf32>, vector<8x96xf32> -> vector<8x96xf32>
    %c2 = arith.constant 2 : index
    %325 = memref.load %arg0[%c2] : memref<8xi32, #tpu.memory_space<smem>>
    %c0_i32_67 = arith.constant 0 : i32
    %326 = arith.cmpi ne, %325, %c0_i32_67 : i32
    %327 = vector.extract_strided_slice %187 {offsets = [16, 0], sizes = [8, 96], strides = [1, 1]} : vector<64x96xf32> to vector<8x96xf32>
    %328 = arith.select %326, %327, %324 : vector<8x96xf32>
    %329 = vector.extract_strided_slice %328 {offsets = [0, 0], sizes = [8, 32], strides = [1, 1]} : vector<8x96xf32> to vector<8x32xf32>
    %330 = vector.extract_strided_slice %192 {offsets = [0, 0], sizes = [8, 32], strides = [1, 1]} : vector<8x96xf32> to vector<8x32xf32>
    %331 = arith.addf %329, %330 : vector<8x32xf32>
    %332 = arith.negf %331 : vector<8x32xf32>
    %333 = math.exp %332 : vector<8x32xf32>
    %cst_68 = arith.constant 1.000000e+00 : f32
    %334 = vector.broadcast %cst_68 : f32 to vector<8x32xf32>
    %335 = arith.addf %334, %333 : vector<8x32xf32>
    %336 = arith.divf %334, %335 : vector<8x32xf32>
    %337 = vector.extract_strided_slice %328 {offsets = [0, 32], sizes = [8, 32], strides = [1, 1]} : vector<8x96xf32> to vector<8x32xf32>
    %338 = vector.extract_strided_slice %192 {offsets = [0, 32], sizes = [8, 32], strides = [1, 1]} : vector<8x96xf32> to vector<8x32xf32>
    %339 = arith.addf %337, %338 : vector<8x32xf32>
    %340 = arith.negf %339 : vector<8x32xf32>
    %341 = math.exp %340 : vector<8x32xf32>
    %cst_69 = arith.constant 1.000000e+00 : f32
    %342 = vector.broadcast %cst_69 : f32 to vector<8x32xf32>
    %343 = arith.addf %342, %341 : vector<8x32xf32>
    %344 = arith.divf %342, %343 : vector<8x32xf32>
    %345 = vector.extract_strided_slice %328 {offsets = [0, 64], sizes = [8, 32], strides = [1, 1]} : vector<8x96xf32> to vector<8x32xf32>
    %346 = vector.extract_strided_slice %192 {offsets = [0, 64], sizes = [8, 32], strides = [1, 1]} : vector<8x96xf32> to vector<8x32xf32>
    %347 = arith.mulf %336, %346 : vector<8x32xf32>
    %348 = arith.addf %345, %347 : vector<8x32xf32>
    %349 = math.tanh %348 : vector<8x32xf32>
    %cst_70 = arith.constant 1.000000e+00 : f32
    %350 = vector.broadcast %cst_70 : f32 to vector<8x32xf32>
    %351 = arith.subf %350, %344 : vector<8x32xf32>
    %352 = arith.mulf %351, %349 : vector<8x32xf32>
    %353 = arith.mulf %344, %186 : vector<8x32xf32>
    %354 = arith.addf %352, %353 : vector<8x32xf32>
    %cst_71 = arith.constant dense<0.000000e+00> : vector<8x32xf32>
    %355 = tpu.matmul %354, %189, %cst_71 {dimension_numbers = #tpu.dot_dimension_numbers<[1], [0], [0], [1], [0, 0, 1, 1], [], []>} : vector<8x32xf32>, vector<32x32xf32>, vector<8x32xf32> -> vector<8x32xf32>
    %356 = arith.addf %355, %8 : vector<8x32xf32>
    %cst_72 = arith.constant dense<0xFF800000> : vector<8xf32>
    %357 = vector.multi_reduction <maximumf>, %356, %cst_72 [1] : vector<8x32xf32> to vector<8xf32>
    %358 = vector.shape_cast %357 : vector<8xf32> to vector<8x1xf32>
    %359 = vector.broadcast %358 : vector<8x1xf32> to vector<8x32xf32>
    %360 = arith.cmpf oge, %356, %359 : vector<8x32xf32>
    %c32_i32_73 = arith.constant 32 : i32
    %361 = vector.broadcast %c32_i32_73 : i32 to vector<8x32xi32>
    %362 = arith.select %360, %9, %361 : vector<8x32xi1>, vector<8x32xi32>
    %cst_74 = arith.constant dense<2147483647> : vector<8xi32>
    %363 = vector.multi_reduction <minsi>, %362, %cst_74 [1] : vector<8x32xi32> to vector<8xi32>
    %364 = vector.shape_cast %363 : vector<8xi32> to vector<8x1xi32>
    %365 = vector.broadcast %364 : vector<8x1xi32> to vector<8x32xi32>
    %366 = arith.cmpi eq, %9, %365 : vector<8x32xi32>
    %367 = arith.extui %366 : vector<8x32xi1> to vector<8x32xi32>
    %368 = arith.sitofp %367 : vector<8x32xi32> to vector<8x32xf32>
    %cst_75 = arith.constant dense<0.000000e+00> : vector<8x96xf32>
    %369 = tpu.matmul %368, %188, %cst_75 {dimension_numbers = #tpu.dot_dimension_numbers<[1], [0], [0], [1], [0, 0, 1, 1], [], []>} : vector<8x32xf32>, vector<32x96xf32>, vector<8x96xf32> -> vector<8x96xf32>
    %c3 = arith.constant 3 : index
    %370 = memref.load %arg0[%c3] : memref<8xi32, #tpu.memory_space<smem>>
    %c0_i32_76 = arith.constant 0 : i32
    %371 = arith.cmpi ne, %370, %c0_i32_76 : i32
    %372 = vector.extract_strided_slice %187 {offsets = [24, 0], sizes = [8, 96], strides = [1, 1]} : vector<64x96xf32> to vector<8x96xf32>
    %373 = arith.select %371, %372, %369 : vector<8x96xf32>
    %374 = vector.extract_strided_slice %373 {offsets = [0, 0], sizes = [8, 32], strides = [1, 1]} : vector<8x96xf32> to vector<8x32xf32>
    %375 = vector.extract_strided_slice %192 {offsets = [0, 0], sizes = [8, 32], strides = [1, 1]} : vector<8x96xf32> to vector<8x32xf32>
    %376 = arith.addf %374, %375 : vector<8x32xf32>
    %377 = arith.negf %376 : vector<8x32xf32>
    %378 = math.exp %377 : vector<8x32xf32>
    %cst_77 = arith.constant 1.000000e+00 : f32
    %379 = vector.broadcast %cst_77 : f32 to vector<8x32xf32>
    %380 = arith.addf %379, %378 : vector<8x32xf32>
    %381 = arith.divf %379, %380 : vector<8x32xf32>
    %382 = vector.extract_strided_slice %373 {offsets = [0, 32], sizes = [8, 32], strides = [1, 1]} : vector<8x96xf32> to vector<8x32xf32>
    %383 = vector.extract_strided_slice %192 {offsets = [0, 32], sizes = [8, 32], strides = [1, 1]} : vector<8x96xf32> to vector<8x32xf32>
    %384 = arith.addf %382, %383 : vector<8x32xf32>
    %385 = arith.negf %384 : vector<8x32xf32>
    %386 = math.exp %385 : vector<8x32xf32>
    %cst_78 = arith.constant 1.000000e+00 : f32
    %387 = vector.broadcast %cst_78 : f32 to vector<8x32xf32>
    %388 = arith.addf %387, %386 : vector<8x32xf32>
    %389 = arith.divf %387, %388 : vector<8x32xf32>
    %390 = vector.extract_strided_slice %373 {offsets = [0, 64], sizes = [8, 32], strides = [1, 1]} : vector<8x96xf32> to vector<8x32xf32>
    %391 = vector.extract_strided_slice %192 {offsets = [0, 64], sizes = [8, 32], strides = [1, 1]} : vector<8x96xf32> to vector<8x32xf32>
    %392 = arith.mulf %381, %391 : vector<8x32xf32>
    %393 = arith.addf %390, %392 : vector<8x32xf32>
    %394 = math.tanh %393 : vector<8x32xf32>
    %cst_79 = arith.constant 1.000000e+00 : f32
    %395 = vector.broadcast %cst_79 : f32 to vector<8x32xf32>
    %396 = arith.subf %395, %389 : vector<8x32xf32>
    %397 = arith.mulf %396, %394 : vector<8x32xf32>
    %398 = arith.mulf %389, %186 : vector<8x32xf32>
    %399 = arith.addf %397, %398 : vector<8x32xf32>
    %cst_80 = arith.constant dense<0.000000e+00> : vector<8x32xf32>
    %400 = tpu.matmul %399, %189, %cst_80 {dimension_numbers = #tpu.dot_dimension_numbers<[1], [0], [0], [1], [0, 0, 1, 1], [], []>} : vector<8x32xf32>, vector<32x32xf32>, vector<8x32xf32> -> vector<8x32xf32>
    %401 = arith.addf %400, %8 : vector<8x32xf32>
    %cst_81 = arith.constant dense<0xFF800000> : vector<8xf32>
    %402 = vector.multi_reduction <maximumf>, %401, %cst_81 [1] : vector<8x32xf32> to vector<8xf32>
    %403 = vector.shape_cast %402 : vector<8xf32> to vector<8x1xf32>
    %404 = vector.broadcast %403 : vector<8x1xf32> to vector<8x32xf32>
    %405 = arith.cmpf oge, %401, %404 : vector<8x32xf32>
    %c32_i32_82 = arith.constant 32 : i32
    %406 = vector.broadcast %c32_i32_82 : i32 to vector<8x32xi32>
    %407 = arith.select %405, %9, %406 : vector<8x32xi1>, vector<8x32xi32>
    %cst_83 = arith.constant dense<2147483647> : vector<8xi32>
    %408 = vector.multi_reduction <minsi>, %407, %cst_83 [1] : vector<8x32xi32> to vector<8xi32>
    %409 = vector.shape_cast %408 : vector<8xi32> to vector<8x1xi32>
    %410 = vector.broadcast %409 : vector<8x1xi32> to vector<8x32xi32>
    %411 = arith.cmpi eq, %9, %410 : vector<8x32xi32>
    %412 = arith.extui %411 : vector<8x32xi1> to vector<8x32xi32>
    %413 = arith.sitofp %412 : vector<8x32xi32> to vector<8x32xf32>
    %cst_84 = arith.constant dense<0.000000e+00> : vector<8x96xf32>
    %414 = tpu.matmul %413, %188, %cst_84 {dimension_numbers = #tpu.dot_dimension_numbers<[1], [0], [0], [1], [0, 0, 1, 1], [], []>} : vector<8x32xf32>, vector<32x96xf32>, vector<8x96xf32> -> vector<8x96xf32>
    %c4 = arith.constant 4 : index
    %415 = memref.load %arg0[%c4] : memref<8xi32, #tpu.memory_space<smem>>
    %c0_i32_85 = arith.constant 0 : i32
    %416 = arith.cmpi ne, %415, %c0_i32_85 : i32
    %417 = vector.extract_strided_slice %187 {offsets = [32, 0], sizes = [8, 96], strides = [1, 1]} : vector<64x96xf32> to vector<8x96xf32>
    %418 = arith.select %416, %417, %414 : vector<8x96xf32>
    %419 = vector.extract_strided_slice %418 {offsets = [0, 0], sizes = [8, 32], strides = [1, 1]} : vector<8x96xf32> to vector<8x32xf32>
    %420 = vector.extract_strided_slice %192 {offsets = [0, 0], sizes = [8, 32], strides = [1, 1]} : vector<8x96xf32> to vector<8x32xf32>
    %421 = arith.addf %419, %420 : vector<8x32xf32>
    %422 = arith.negf %421 : vector<8x32xf32>
    %423 = math.exp %422 : vector<8x32xf32>
    %cst_86 = arith.constant 1.000000e+00 : f32
    %424 = vector.broadcast %cst_86 : f32 to vector<8x32xf32>
    %425 = arith.addf %424, %423 : vector<8x32xf32>
    %426 = arith.divf %424, %425 : vector<8x32xf32>
    %427 = vector.extract_strided_slice %418 {offsets = [0, 32], sizes = [8, 32], strides = [1, 1]} : vector<8x96xf32> to vector<8x32xf32>
    %428 = vector.extract_strided_slice %192 {offsets = [0, 32], sizes = [8, 32], strides = [1, 1]} : vector<8x96xf32> to vector<8x32xf32>
    %429 = arith.addf %427, %428 : vector<8x32xf32>
    %430 = arith.negf %429 : vector<8x32xf32>
    %431 = math.exp %430 : vector<8x32xf32>
    %cst_87 = arith.constant 1.000000e+00 : f32
    %432 = vector.broadcast %cst_87 : f32 to vector<8x32xf32>
    %433 = arith.addf %432, %431 : vector<8x32xf32>
    %434 = arith.divf %432, %433 : vector<8x32xf32>
    %435 = vector.extract_strided_slice %418 {offsets = [0, 64], sizes = [8, 32], strides = [1, 1]} : vector<8x96xf32> to vector<8x32xf32>
    %436 = vector.extract_strided_slice %192 {offsets = [0, 64], sizes = [8, 32], strides = [1, 1]} : vector<8x96xf32> to vector<8x32xf32>
    %437 = arith.mulf %426, %436 : vector<8x32xf32>
    %438 = arith.addf %435, %437 : vector<8x32xf32>
    %439 = math.tanh %438 : vector<8x32xf32>
    %cst_88 = arith.constant 1.000000e+00 : f32
    %440 = vector.broadcast %cst_88 : f32 to vector<8x32xf32>
    %441 = arith.subf %440, %434 : vector<8x32xf32>
    %442 = arith.mulf %441, %439 : vector<8x32xf32>
    %443 = arith.mulf %434, %186 : vector<8x32xf32>
    %444 = arith.addf %442, %443 : vector<8x32xf32>
    %cst_89 = arith.constant dense<0.000000e+00> : vector<8x32xf32>
    %445 = tpu.matmul %444, %189, %cst_89 {dimension_numbers = #tpu.dot_dimension_numbers<[1], [0], [0], [1], [0, 0, 1, 1], [], []>} : vector<8x32xf32>, vector<32x32xf32>, vector<8x32xf32> -> vector<8x32xf32>
    %446 = arith.addf %445, %8 : vector<8x32xf32>
    %cst_90 = arith.constant dense<0xFF800000> : vector<8xf32>
    %447 = vector.multi_reduction <maximumf>, %446, %cst_90 [1] : vector<8x32xf32> to vector<8xf32>
    %448 = vector.shape_cast %447 : vector<8xf32> to vector<8x1xf32>
    %449 = vector.broadcast %448 : vector<8x1xf32> to vector<8x32xf32>
    %450 = arith.cmpf oge, %446, %449 : vector<8x32xf32>
    %c32_i32_91 = arith.constant 32 : i32
    %451 = vector.broadcast %c32_i32_91 : i32 to vector<8x32xi32>
    %452 = arith.select %450, %9, %451 : vector<8x32xi1>, vector<8x32xi32>
    %cst_92 = arith.constant dense<2147483647> : vector<8xi32>
    %453 = vector.multi_reduction <minsi>, %452, %cst_92 [1] : vector<8x32xi32> to vector<8xi32>
    %454 = vector.shape_cast %453 : vector<8xi32> to vector<8x1xi32>
    %455 = vector.broadcast %454 : vector<8x1xi32> to vector<8x32xi32>
    %456 = arith.cmpi eq, %9, %455 : vector<8x32xi32>
    %457 = arith.extui %456 : vector<8x32xi1> to vector<8x32xi32>
    %458 = arith.sitofp %457 : vector<8x32xi32> to vector<8x32xf32>
    %cst_93 = arith.constant dense<0.000000e+00> : vector<8x96xf32>
    %459 = tpu.matmul %458, %188, %cst_93 {dimension_numbers = #tpu.dot_dimension_numbers<[1], [0], [0], [1], [0, 0, 1, 1], [], []>} : vector<8x32xf32>, vector<32x96xf32>, vector<8x96xf32> -> vector<8x96xf32>
    %c5 = arith.constant 5 : index
    %460 = memref.load %arg0[%c5] : memref<8xi32, #tpu.memory_space<smem>>
    %c0_i32_94 = arith.constant 0 : i32
    %461 = arith.cmpi ne, %460, %c0_i32_94 : i32
    %462 = vector.extract_strided_slice %187 {offsets = [40, 0], sizes = [8, 96], strides = [1, 1]} : vector<64x96xf32> to vector<8x96xf32>
    %463 = arith.select %461, %462, %459 : vector<8x96xf32>
    %464 = vector.extract_strided_slice %463 {offsets = [0, 0], sizes = [8, 32], strides = [1, 1]} : vector<8x96xf32> to vector<8x32xf32>
    %465 = vector.extract_strided_slice %192 {offsets = [0, 0], sizes = [8, 32], strides = [1, 1]} : vector<8x96xf32> to vector<8x32xf32>
    %466 = arith.addf %464, %465 : vector<8x32xf32>
    %467 = arith.negf %466 : vector<8x32xf32>
    %468 = math.exp %467 : vector<8x32xf32>
    %cst_95 = arith.constant 1.000000e+00 : f32
    %469 = vector.broadcast %cst_95 : f32 to vector<8x32xf32>
    %470 = arith.addf %469, %468 : vector<8x32xf32>
    %471 = arith.divf %469, %470 : vector<8x32xf32>
    %472 = vector.extract_strided_slice %463 {offsets = [0, 32], sizes = [8, 32], strides = [1, 1]} : vector<8x96xf32> to vector<8x32xf32>
    %473 = vector.extract_strided_slice %192 {offsets = [0, 32], sizes = [8, 32], strides = [1, 1]} : vector<8x96xf32> to vector<8x32xf32>
    %474 = arith.addf %472, %473 : vector<8x32xf32>
    %475 = arith.negf %474 : vector<8x32xf32>
    %476 = math.exp %475 : vector<8x32xf32>
    %cst_96 = arith.constant 1.000000e+00 : f32
    %477 = vector.broadcast %cst_96 : f32 to vector<8x32xf32>
    %478 = arith.addf %477, %476 : vector<8x32xf32>
    %479 = arith.divf %477, %478 : vector<8x32xf32>
    %480 = vector.extract_strided_slice %463 {offsets = [0, 64], sizes = [8, 32], strides = [1, 1]} : vector<8x96xf32> to vector<8x32xf32>
    %481 = vector.extract_strided_slice %192 {offsets = [0, 64], sizes = [8, 32], strides = [1, 1]} : vector<8x96xf32> to vector<8x32xf32>
    %482 = arith.mulf %471, %481 : vector<8x32xf32>
    %483 = arith.addf %480, %482 : vector<8x32xf32>
    %484 = math.tanh %483 : vector<8x32xf32>
    %cst_97 = arith.constant 1.000000e+00 : f32
    %485 = vector.broadcast %cst_97 : f32 to vector<8x32xf32>
    %486 = arith.subf %485, %479 : vector<8x32xf32>
    %487 = arith.mulf %486, %484 : vector<8x32xf32>
    %488 = arith.mulf %479, %186 : vector<8x32xf32>
    %489 = arith.addf %487, %488 : vector<8x32xf32>
    %cst_98 = arith.constant dense<0.000000e+00> : vector<8x32xf32>
    %490 = tpu.matmul %489, %189, %cst_98 {dimension_numbers = #tpu.dot_dimension_numbers<[1], [0], [0], [1], [0, 0, 1, 1], [], []>} : vector<8x32xf32>, vector<32x32xf32>, vector<8x32xf32> -> vector<8x32xf32>
    %491 = arith.addf %490, %8 : vector<8x32xf32>
    %cst_99 = arith.constant dense<0xFF800000> : vector<8xf32>
    %492 = vector.multi_reduction <maximumf>, %491, %cst_99 [1] : vector<8x32xf32> to vector<8xf32>
    %493 = vector.shape_cast %492 : vector<8xf32> to vector<8x1xf32>
    %494 = vector.broadcast %493 : vector<8x1xf32> to vector<8x32xf32>
    %495 = arith.cmpf oge, %491, %494 : vector<8x32xf32>
    %c32_i32_100 = arith.constant 32 : i32
    %496 = vector.broadcast %c32_i32_100 : i32 to vector<8x32xi32>
    %497 = arith.select %495, %9, %496 : vector<8x32xi1>, vector<8x32xi32>
    %cst_101 = arith.constant dense<2147483647> : vector<8xi32>
    %498 = vector.multi_reduction <minsi>, %497, %cst_101 [1] : vector<8x32xi32> to vector<8xi32>
    %499 = vector.shape_cast %498 : vector<8xi32> to vector<8x1xi32>
    %500 = vector.broadcast %499 : vector<8x1xi32> to vector<8x32xi32>
    %501 = arith.cmpi eq, %9, %500 : vector<8x32xi32>
    %502 = arith.extui %501 : vector<8x32xi1> to vector<8x32xi32>
    %503 = arith.sitofp %502 : vector<8x32xi32> to vector<8x32xf32>
    %cst_102 = arith.constant dense<0.000000e+00> : vector<8x96xf32>
    %504 = tpu.matmul %503, %188, %cst_102 {dimension_numbers = #tpu.dot_dimension_numbers<[1], [0], [0], [1], [0, 0, 1, 1], [], []>} : vector<8x32xf32>, vector<32x96xf32>, vector<8x96xf32> -> vector<8x96xf32>
    %c6 = arith.constant 6 : index
    %505 = memref.load %arg0[%c6] : memref<8xi32, #tpu.memory_space<smem>>
    %c0_i32_103 = arith.constant 0 : i32
    %506 = arith.cmpi ne, %505, %c0_i32_103 : i32
    %507 = vector.extract_strided_slice %187 {offsets = [48, 0], sizes = [8, 96], strides = [1, 1]} : vector<64x96xf32> to vector<8x96xf32>
    %508 = arith.select %506, %507, %504 : vector<8x96xf32>
    %509 = vector.extract_strided_slice %508 {offsets = [0, 0], sizes = [8, 32], strides = [1, 1]} : vector<8x96xf32> to vector<8x32xf32>
    %510 = vector.extract_strided_slice %192 {offsets = [0, 0], sizes = [8, 32], strides = [1, 1]} : vector<8x96xf32> to vector<8x32xf32>
    %511 = arith.addf %509, %510 : vector<8x32xf32>
    %512 = arith.negf %511 : vector<8x32xf32>
    %513 = math.exp %512 : vector<8x32xf32>
    %cst_104 = arith.constant 1.000000e+00 : f32
    %514 = vector.broadcast %cst_104 : f32 to vector<8x32xf32>
    %515 = arith.addf %514, %513 : vector<8x32xf32>
    %516 = arith.divf %514, %515 : vector<8x32xf32>
    %517 = vector.extract_strided_slice %508 {offsets = [0, 32], sizes = [8, 32], strides = [1, 1]} : vector<8x96xf32> to vector<8x32xf32>
    %518 = vector.extract_strided_slice %192 {offsets = [0, 32], sizes = [8, 32], strides = [1, 1]} : vector<8x96xf32> to vector<8x32xf32>
    %519 = arith.addf %517, %518 : vector<8x32xf32>
    %520 = arith.negf %519 : vector<8x32xf32>
    %521 = math.exp %520 : vector<8x32xf32>
    %cst_105 = arith.constant 1.000000e+00 : f32
    %522 = vector.broadcast %cst_105 : f32 to vector<8x32xf32>
    %523 = arith.addf %522, %521 : vector<8x32xf32>
    %524 = arith.divf %522, %523 : vector<8x32xf32>
    %525 = vector.extract_strided_slice %508 {offsets = [0, 64], sizes = [8, 32], strides = [1, 1]} : vector<8x96xf32> to vector<8x32xf32>
    %526 = vector.extract_strided_slice %192 {offsets = [0, 64], sizes = [8, 32], strides = [1, 1]} : vector<8x96xf32> to vector<8x32xf32>
    %527 = arith.mulf %516, %526 : vector<8x32xf32>
    %528 = arith.addf %525, %527 : vector<8x32xf32>
    %529 = math.tanh %528 : vector<8x32xf32>
    %cst_106 = arith.constant 1.000000e+00 : f32
    %530 = vector.broadcast %cst_106 : f32 to vector<8x32xf32>
    %531 = arith.subf %530, %524 : vector<8x32xf32>
    %532 = arith.mulf %531, %529 : vector<8x32xf32>
    %533 = arith.mulf %524, %186 : vector<8x32xf32>
    %534 = arith.addf %532, %533 : vector<8x32xf32>
    %cst_107 = arith.constant dense<0.000000e+00> : vector<8x32xf32>
    %535 = tpu.matmul %534, %189, %cst_107 {dimension_numbers = #tpu.dot_dimension_numbers<[1], [0], [0], [1], [0, 0, 1, 1], [], []>} : vector<8x32xf32>, vector<32x32xf32>, vector<8x32xf32> -> vector<8x32xf32>
    %536 = arith.addf %535, %8 : vector<8x32xf32>
    %537 = tpu.concatenate %221, %266, %311, %356, %401, %446, %491, %536 in 0 : vector<8x32xf32>, vector<8x32xf32>, vector<8x32xf32>, vector<8x32xf32>, vector<8x32xf32>, vector<8x32xf32>, vector<8x32xf32>, vector<8x32xf32> -> vector<64x32xf32>
    %c0_108 = arith.constant 0 : index
    %c0_109 = arith.constant 0 : index
    %538 = vector.load %arg10[%c0_108, %c0_109] : memref<64x32xf32, #tpu.memory_space<vmem>>, vector<64x32xf32>
    tpu.vector_store %arg10[%c0_108, %c0_109], %537 {strides = array<i32>} : memref<64x32xf32, #tpu.memory_space<vmem>>, vector<64x32xf32>,
    return
  }
}

</mosaic_0001>

<bundles_post_ra>
// kernel: tpu_custom_call.1
= control target key start
LH: loop header
LB: loop body
LE: loop exit
PB: predicated region body
PF: predicated region fallthrough
CT: control target
= control target key end

     0   :  { %15 = vsyncpa [#allocation4], 0  ;;  %s3680_s0 = inlined_call_operand.hbm [shape: s32[8], index: 0, kind: input, shape index: {}]   ;;  %s3681_s1 = inlined_call_operand.hbm [shape: f32[48,96], index: 1, kind: input, shape index: {}]   ;;  %s3682_s2 = inlined_call_operand.hbm [shape: f32[64,96], index: 2, kind: input, shape index: {}]   ;;  %s3683_s3 = inlined_call_operand.hbm [shape: f32[32,96], index: 3, kind: input, shape index: {}]   ;;  %s3684_s4 = inlined_call_operand.vmem [shape: f32[1,96], index: 4, kind: input, shape index: {}]   ;;  %s3685_s5 = inlined_call_operand.hbm [shape: f32[32,96], index: 5, kind: input, shape index: {}]   ;;  %s3686_s6 = inlined_call_operand.vmem [shape: f32[1,96], index: 6, kind: input, shape index: {}]   ;;  %s3687_s7 = inlined_call_operand.hbm [shape: f32[32,96], index: 7, kind: input, shape index: {}]   ;;  %s3688_s8 = inlined_call_operand.hbm [shape: f32[32,32], index: 8, kind: input, shape index: {}]   ;;  %s3689_s9 = inlined_call_operand.vmem [shape: f32[1,32], index: 9, kind: input, shape index: {}]   ;;  %s3690_s10 = inlined_call_operand.vmem [shape: f32[64,32], index: 10, kind: output, shape index: {}]  }
   0x1   :  { %16 = vsyncpa [#allocation3], 0 }
   0x2   :  { %17 = vsyncpa [#allocation7], 0 }
   0x3   :  { %18 = vsyncpa [#allocation10], 0 }
   0x4   :  { %19 = vsyncpa [#allocation13], 0  ;;  %s3156_s13 = smov [#allocation6]   ;;  %s3157_s15 = smov [#allocation9]  }
   0x5   :  { %s45_s14 = sshll.u32 %s3156_s13, 4  ;;  %s71_s16 = sshll.u32 %s3157_s15, 4  ;;  %s46_s14 = int_to_ptr.vmem [resolvable:$true] %s45_s14  ;;  %s3225_s16 = int_to_ptr.vmem [resolvable:$true] %s71_s16 }
   0x6   :  { %s3004_s19 = scalar_lea.hbm %s3682_s2, 1024 }
   0x7   :  { %p3005_p0 = scmp.ne.s32.totalorder %s3682_s2, %s3004_s19  ;;  %p3008_p1 = scmp.lt.u32.totalorder %s3004_s19, %s3682_s2 }
   0x9   :  { %p3010_p2 = pnand %p3008_p1, %p3005_p0 }
   0xb   :  { %3013 = shalt.err (!%p3010_p2)
}
   0xc   :  { %s3014_s24 = scalar_lea.vmem %s46_s14, 1024  ;;  %p3019_p4 = scmp.lt.s32.totalorder %s46_s14, %s46_s14 }
   0xd   :  { %p3015_p3 = scmp.ne.s32.totalorder %s46_s14, %s3014_s24  ;;  %p3020_p5 = scmp.lt.s32.totalorder %s3014_s24, %s3014_s24 }
   0xf   :  { %p3021_p6 = por %p3020_p5, %p3019_p4 }
  0x11   :  { %p3022_p7 = pnand %p3021_p6, %p3015_p3 }
  0x13   :  { %3025 = shalt.err (!%p3022_p7)
}
  0x14   :  { %s3158_s25 = smov 128   ;;  %s3159_s26 = smov 8  }
  0x15   :  { %51 = dma.hbm_to_vmem [thread:$0]  %s3682_s2, 1024, %s46_s14, [#allocation7], %s3158_s25, %s3158_s25, %s3159_s26  }
  0x16   :  { %s3026_s11 = scalar_lea.hbm %s3685_s5, 512 }
  0x17   :  { %p3027_p8 = scmp.ne.s32.totalorder %s3685_s5, %s3026_s11  ;;  %p3030_p9 = scmp.lt.u32.totalorder %s3026_s11, %s3685_s5 }
  0x19   :  { %p3032_p10 = pnand %p3030_p9, %p3027_p8 }
  0x1b   :  { %3035 = shalt.err (!%p3032_p10)
}
  0x1c   :  { %s3036_s18 = scalar_lea.vmem %s3225_s16, 512  ;;  %p3041_p12 = scmp.lt.s32.totalorder %s3225_s16, %s3225_s16 }
  0x1d   :  { %p3037_p11 = scmp.ne.s32.totalorder %s3225_s16, %s3036_s18  ;;  %p3042_p13 = scmp.lt.s32.totalorder %s3036_s18, %s3036_s18 }
  0x1f   :  { %p3043_p0 = por %p3042_p13, %p3041_p12 }
  0x21   :  { %p3044_p1 = pnand %p3043_p0, %p3037_p11 }
  0x23   :  { %3047 = shalt.err (!%p3044_p1)
}
  0x24   :  { %77 = dma.hbm_to_vmem [thread:$0]  %s3685_s5, 512, %s3225_s16, [#allocation10], %s3158_s25, %s3158_s25, %s3159_s26  }
  0x25   :  { %s3048_s21 = scalar_lea.hbm %s3680_s0, 16 }
  0x26   :  { %p3049_p2 = scmp.ne.s32.totalorder %s3680_s0, %s3048_s21  ;;  %p3052_p3 = scmp.lt.u32.totalorder %s3048_s21, %s3680_s0 }
  0x28   :  { %p3054_p4 = pnand %p3052_p3, %p3049_p2 }
  0x2a   :  { %3057 = shalt.err (!%p3054_p4)
}
  0x2b   :  { %s3160_s28 = smov [#allocation2]   ;;  %s3161_s5 = smov [#allocation5]  }
  0x2c   :  { %27 = dma.hbm_to_smem %s3680_s0, 16, %s3160_s28, [#allocation4]  }
  0x2d   :  { %s33_s16 = sshll.u32 %s3161_s5, 4  ;;  %s3162_s11 = smov [#allocation8]   ;;  %s34_s16 = int_to_ptr.vmem [resolvable:$true] %s33_s16 }
  0x2e   :  { %s57_s12 = sshll.u32 %s3162_s11, 4  ;;  %s3058_s17 = scalar_lea.hbm %s3681_s1, 768  ;;  %s58_s12 = int_to_ptr.vmem [resolvable:$true] %s57_s12 }
  0x2f   :  { %p3059_p5 = scmp.ne.s32.totalorder %s3681_s1, %s3058_s17  ;;  %p3062_p6 = scmp.lt.u32.totalorder %s3058_s17, %s3681_s1 }
  0x31   :  { %p3064_p7 = pnand %p3062_p6, %p3059_p5 }
  0x33   :  { %3067 = shalt.err (!%p3064_p7)
}
  0x34   :  { %s3068_s0 = scalar_lea.vmem %s34_s16, 768  ;;  %p3073_p9 = scmp.lt.s32.totalorder %s34_s16, %s34_s16 }
  0x35   :  { %p3069_p8 = scmp.ne.s32.totalorder %s34_s16, %s3068_s0  ;;  %p3074_p10 = scmp.lt.s32.totalorder %s3068_s0, %s3068_s0 }
  0x37   :  { %p3075_p11 = por %p3074_p10, %p3073_p9 }
  0x39   :  { %p3076_p12 = pnand %p3075_p11, %p3069_p8 }
  0x3b   :  { %3079 = shalt.err (!%p3076_p12)
}
  0x3c   :  { %39 = dma.hbm_to_vmem [thread:$0]  %s3681_s1, 768, %s34_s16, [#allocation3], %s3158_s25, %s3158_s25, %s3159_s26  }
  0x3d   :  { %s3080_s24 = scalar_lea.hbm %s3683_s3, 512 }
  0x3e   :  { %p3081_p13 = scmp.ne.s32.totalorder %s3683_s3, %s3080_s24  ;;  %p3084_p0 = scmp.lt.u32.totalorder %s3080_s24, %s3683_s3 }
  0x40   :  { %p3086_p1 = pnand %p3084_p0, %p3081_p13 }
  0x42   :  { %3089 = shalt.err (!%p3086_p1)
}
  0x43   :  { %s3090_s5 = scalar_lea.vmem %s58_s12, 512  ;;  %p3095_p3 = scmp.lt.s32.totalorder %s58_s12, %s58_s12 }
  0x44   :  { %p3091_p2 = scmp.ne.s32.totalorder %s58_s12, %s3090_s5  ;;  %p3096_p4 = scmp.lt.s32.totalorder %s3090_s5, %s3090_s5 }
  0x46   :  { %p3097_p5 = por %p3096_p4, %p3095_p3 }
  0x48   :  { %p3098_p6 = pnand %p3097_p5, %p3091_p2 }
  0x4a   :  { %3101 = shalt.err (!%p3098_p6)
}
  0x4b   :  { %63 = dma.hbm_to_vmem [thread:$0]  %s3683_s3, 512, %s58_s12, [#allocation7], %s3158_s25, %s3158_s25, %s3159_s26  }
  0x4c   :  { %s3163_s11 = smov [#allocation11]   ;;  %s3164_s15 = smov [#allocation12]  }
  0x4d   :  { %s85_s13 = sshll.u32 %s3163_s11, 4  ;;  %s97_s17 = sshll.u32 %s3164_s15, 4  ;;  %s86_s13 = int_to_ptr.vmem [resolvable:$true] %s85_s13  ;;  %s98_s17 = int_to_ptr.vmem [resolvable:$true] %s97_s17 }
  0x4e   :  { %s3102_s14 = scalar_lea.hbm %s3687_s7, 512 }
  0x4f   :  { %p3103_p7 = scmp.ne.s32.totalorder %s3687_s7, %s3102_s14  ;;  %p3106_p8 = scmp.lt.u32.totalorder %s3102_s14, %s3687_s7 }
  0x51   :  { %p3108_p9 = pnand %p3106_p8, %p3103_p7 }
  0x53   :  { %3111 = shalt.err (!%p3108_p9)
}
  0x54   :  { %s3112_s3 = scalar_lea.vmem %s86_s13, 512  ;;  %p3117_p11 = scmp.lt.s32.totalorder %s86_s13, %s86_s13 }
  0x55   :  { %p3113_p10 = scmp.ne.s32.totalorder %s86_s13, %s3112_s3  ;;  %p3118_p12 = scmp.lt.s32.totalorder %s3112_s3, %s3112_s3 }
  0x57   :  { %p3119_p13 = por %p3118_p12, %p3117_p11 }
  0x59   :  { %p3120_p0 = pnand %p3119_p13, %p3113_p10 }
  0x5b   :  { %3123 = shalt.err (!%p3120_p0)
}
  0x5c   :  { %91 = dma.hbm_to_vmem [thread:$0]  %s3687_s7, 512, %s86_s13, [#allocation10], %s3158_s25, %s3158_s25, %s3159_s26  }
  0x5d   :  { %s3124_s27 = scalar_lea.hbm %s3688_s8, 512 }
  0x5e   :  { %p3125_p1 = scmp.ne.s32.totalorder %s3688_s8, %s3124_s27  ;;  %p3128_p2 = scmp.lt.u32.totalorder %s3124_s27, %s3688_s8 }
  0x60   :  { %p3130_p3 = pnand %p3128_p2, %p3125_p1 }
  0x62   :  { %3133 = shalt.err (!%p3130_p3)
}
  0x63   :  { %s3134_s1 = scalar_lea.vmem %s98_s17, 512  ;;  %p3139_p5 = scmp.lt.s32.totalorder %s98_s17, %s98_s17 }
  0x64   :  { %p3135_p4 = scmp.ne.s32.totalorder %s98_s17, %s3134_s1  ;;  %p3140_p6 = scmp.lt.s32.totalorder %s3134_s1, %s3134_s1 }
  0x66   :  { %p3141_p7 = por %p3140_p6, %p3139_p5 }
  0x68   :  { %p3142_p8 = pnand %p3141_p7, %p3135_p4 }
  0x6a   :  { %3145 = shalt.err (!%p3142_p8)
}
  0x6b   :  { %103 = dma.hbm_to_vmem [thread:$0]  %s3688_s8, 512, %s98_s17, [#allocation13], %s3158_s25, %s3158_s25, %s3159_s26  }
  0x6c   :  { %3146 = dma.done.wait [#allocation4], 16  }
  0x6d   :  { %3147 = vsyncadd [#allocation4], 4294967280 }
  0x6e   :  { %3148 = dma.done.wait [#allocation3], 768  }
  0x6f   :  { %3149 = vsyncadd [#allocation3], 4294966528 }
  0x70   :  { %3150 = dma.done.wait [#allocation7], 1536  }
  0x71   :  { %3151 = vsyncadd [#allocation7], 4294965760 }
  0x72   :  { %3152 = dma.done.wait [#allocation10], 1024  }
  0x73   :  { %3153 = vsyncadd [#allocation10], 4294966272 }
  0x74   :  { %3154 = dma.done.wait [#allocation13], 512  }
  0x75   :  { %3155 = vsyncadd [#allocation13], 4294966784 }
  0x76   :  { %127 = sfence }
  0x77   :  { %v157_v0 = vld [vmem:[#allocation8] sm:$0xff]  ;;  %v158_v1 = vld [vmem:[#allocation8 + $0x8] sm:$0xff]  ;;  %v159_v2 = vld [vmem:[#allocation8 + $0x10] sm:$0xff]  ;;  %v3165_v3 = vmov 0.0|0.0   ;;  %vm3166_vm0 = vmmov 0   ;;  %v3167_v6 = vmov 0.0  }
  0x78   :  { %2774 = vmatprep.subr.bf16.mxu0 %v3165_v3  ;;  %v3335_v4 = vpack.c.bf16 %v158_v1, %v157_v0  ;;  %v160_v5 = vld [vmem:[#allocation8 + $0x18] sm:$0xff]  ;;  %2540 = vmatprep.mubr.msk.f32.mxu0 %vm3166_vm0, %v3167_v6  ;;  %v3362_v8 = vld [vmem:[%s3684_s4] ss:$0 sm:$0xff]  ;;  %s3168_s26 = smov 64   ;;  %s3169_s4 = smov 96   ;;  %vm161_vm1 = vcmask 261120  }
  0x79   :  { %2780 = vmatprep.subr.bf16.mxu1 %v3165_v3  ;;  %2551 = vmatprep.mubr.msk.f32.mxu1 %vm3166_vm0, %v3167_v6  ;;  %v3343_v7 = vpack.c.bf16 %v160_v5, %v159_v2  ;;  %v151_v12 = vld [vmem:[#allocation5] sm:$0xff]  ;;  %v152_v32 = vld [vmem:[#allocation5 + $0x8] sm:$0xff]  ;;  %v153_v52 = vld [vmem:[#allocation5 + $0x10] sm:$0xff]  ;;  %s2394_s0 = sld [smem:[#allocation2 + $0x1]]  ;;  %s2399_s12 = sld [smem:[#allocation2 + $0x2]] }
  0x7a   :  { %2776 = vmatpush3.bf16.msra.mxu0 %v3335_v4  ;;  %2782 = vmatpush3.bf16.msra.mxu1 %v3335_v4  ;;  %s2404_s27 = sld [smem:[#allocation2 + $0x3]]  ;;  %s2409_s5 = sld [smem:[#allocation2 + $0x4]] }
  0x7b   :  { %2777 = vmatprep.subr.bf16.mxu0 %v3165_v3  ;;  %2783 = vmatprep.subr.bf16.mxu1 %v3165_v3  ;;  %s2414_s8 = sld [smem:[#allocation2 + $0x5]] }
  0x7e   :  { %2779 = vmatpush3.bf16.msra.mxu0 %v3343_v7  ;;  %2785 = vmatpush3.bf16.msra.mxu1 %v3343_v7 }
  0x7f   :  { %2786 = vmatprep.subr.bf16.mxu0 %v3165_v3  ;;  %2792 = vmatprep.subr.bf16.mxu1 %v3165_v3  ;;  %p1257_p10 = scmp.ne.s32.totalorder %s2394_s0, 0  ;;  %p1456_p11 = scmp.ne.s32.totalorder %s2399_s12, 0 }
  0x80   :  { %p1655_p12 = scmp.ne.s32.totalorder %s2404_s27, 0  ;;  %p1854_p13 = scmp.ne.s32.totalorder %s2409_s5, 0 }
  0x81   :  { %2541 = vmatmul.mubr.f32.vlgmr.msra.gmra.mrb[0].mxu0 %v3167_v6  ;;  %s1258_s20 = scalar_select %p1257_p10, 1, 0 }
  0x82   :  { %2788 = vmatpush3.bf16.msra.mxu0 %v3335_v4  ;;  %2562 = vmatprep.mubr.msk.f32.mxu0 %vm3166_vm0, %v3167_v6  ;;  %s1457_s22 = scalar_select %p1456_p11, 1, 0 }
  0x83   :  { %2789 = vmatprep.subr.bf16.mxu0 %v3165_v3  ;;  %s1656_s28 = scalar_select %p1655_p12, 1, 0 }
  0x84   :  { %s1855_s1 = scalar_select %p1854_p13, 1, 0 }
  0x85   :  { %p2053_p0 = scmp.ne.s32.totalorder %s2414_s8, 0 }
  0x86   :  { %2791 = vmatpush3.bf16.msra.mxu0 %v3343_v7 }
  0x87   :  { %2798 = vmatprep.subr.bf16.mxu0 %v3165_v3  ;;  %s2054_s25 = scalar_select %p2053_p0, 1, 0 }
 0x154   :  { %v231_v9 = vpop.f32.mrb[0].mxu0 }
 0x155   :  { %v232_v10 = vadd.f32 %v3362_v8, %v231_v9  ;;  %v2542_v11 = vpop.f32.mrb[1].mxu0 }
 0x157   :  { %243 = vrot.lane.b32.xlu0 %v232_v10, %s3168_s26  ;;  %v235_v13 = vadd.f32 %v232_v10, %v151_v12 }
 0x159   :  { %v2374_v14 = vmul.f32 -1.442695, %v235_v13  ;;  %v154_v13 = vld [vmem:[#allocation5 + $0x18] sm:$0xff] }
 0x15b   :  { %2920 = vpow2.f32 %v2374_v14 }
 0x165   :  { %v2921_v15 = vpop.eup %2920 }
 0x166   :  { %v239_v16 = vadd.f32 1.0, %v2921_v15 }
 0x168   :  { %2922 = vrcp.f32 %v239_v16 }
 0x172   :  { %v2923_v17 = vpop.eup %2922 }
 0x173   :  { %v253_v23 = vsub.f32 1.0, %v2923_v17  ;;  %v259_v25 = vmul.f32 0.0, %v2923_v17 }
 0x1c9   :  { %v244_v18 = vpop.permute.xlu0 %243 }
 0x1ca   :  { %v246_v19 = vmul.f32 %v2923_v17, %v244_v18 }
 0x1cc   :  { %248 = vrot.lane.b32.xlu0 %v246_v19, %s3168_s26 }
 0x23e   :  { %v249_v20 = vpop.permute.xlu0 %248 }
 0x23f   :  { %v251_v21 = vadd.f32 %v249_v20, %v151_v12 }
 0x241   :  { %2924 = vtanh.f32 %v251_v21 }
 0x24b   :  { %v2925_v22 = vpop.eup %2924 }
 0x24c   :  { %255 = vrot.lane.b32.xlu1 %v2925_v22, %s3169_s4 }
 0x2be   :  { %v256_v24 = vpop.permute.xlu1 %255 }
 0x2bf   :  { %v258_v26 = vmul.f32 %v256_v24, %v253_v23 }
 0x2c1   :  { %v260_v27 = vadd.f32 %v259_v25, %v258_v26 }
 0x2c3   :  { %262 = vrot.lane.b32.xlu1 %v260_v27, %s3169_s4 }
 0x335   :  { %v263_v28 = vpop.permute.xlu1 %262 }
 0x336   :  { %2552 = vmatmul.mubr.msk.f32.vlgmr.msra.gmra.mrb[0].mxu1 %vm161_vm1, %v263_v28 }
 0x337   :  { %2794 = vmatpush3.bf16.msra.mxu1 %v3335_v4  ;;  %2573 = vmatprep.mubr.msk.f32.mxu1 %vm3166_vm0, %v3167_v6 }
 0x338   :  { %2795 = vmatprep.subr.bf16.mxu1 %v3165_v3 }
 0x33b   :  { %2797 = vmatpush3.bf16.msra.mxu1 %v3343_v7 }
 0x33c   :  { %2804 = vmatprep.subr.bf16.mxu1 %v3165_v3 }
 0x409   :  { %v332_v29 = vpop.f32.mrb[0].mxu1 }
 0x40a   :  { %v333_v30 = vadd.f32 %v3362_v8, %v332_v29  ;;  %v2553_v31 = vpop.f32.mrb[1].mxu1 }
 0x40b   :  { %v155_v31 = vld [vmem:[#allocation5 + $0x20] sm:$0xff] }
 0x40c   :  { %344 = vrot.lane.b32.xlu0 %v333_v30, %s3168_s26  ;;  %v336_v33 = vadd.f32 %v333_v30, %v152_v32 }
 0x40e   :  { %v2376_v34 = vmul.f32 -1.442695, %v336_v33 }
 0x410   :  { %2926 = vpow2.f32 %v2376_v34 }
 0x41a   :  { %v2927_v35 = vpop.eup %2926 }
 0x41b   :  { %v340_v36 = vadd.f32 1.0, %v2927_v35 }
 0x41d   :  { %2928 = vrcp.f32 %v340_v36 }
 0x427   :  { %v2929_v37 = vpop.eup %2928 }
 0x428   :  { %v354_v43 = vsub.f32 1.0, %v2929_v37  ;;  %v360_v45 = vmul.f32 %v2929_v37, %v260_v27 }
 0x47e   :  { %v345_v38 = vpop.permute.xlu0 %344 }
 0x47f   :  { %v347_v39 = vmul.f32 %v2929_v37, %v345_v38 }
 0x481   :  { %349 = vrot.lane.b32.xlu1 %v347_v39, %s3168_s26 }
 0x4f3   :  { %v350_v40 = vpop.permute.xlu1 %349 }
 0x4f4   :  { %v352_v41 = vadd.f32 %v350_v40, %v152_v32 }
 0x4f6   :  { %2930 = vtanh.f32 %v352_v41 }
 0x500   :  { %v2931_v42 = vpop.eup %2930 }
 0x501   :  { %356 = vrot.lane.b32.xlu0 %v2931_v42, %s3169_s4 }
 0x573   :  { %v357_v44 = vpop.permute.xlu0 %356 }
 0x574   :  { %v359_v46 = vmul.f32 %v357_v44, %v354_v43 }
 0x576   :  { %v361_v47 = vadd.f32 %v360_v45, %v359_v46 }
 0x578   :  { %363 = vrot.lane.b32.xlu1 %v361_v47, %s3169_s4 }
 0x5ea   :  { %v364_v48 = vpop.permute.xlu1 %363 }
 0x5eb   :  { %2563 = vmatmul.mubr.msk.f32.vlgmr.msra.gmra.mrb[2].mxu0 %vm161_vm1, %v364_v48 }
 0x5ec   :  { %2800 = vmatpush3.bf16.msra.mxu0 %v3335_v4  ;;  %2584 = vmatprep.mubr.msk.f32.mxu0 %vm3166_vm0, %v3167_v6 }
 0x5ed   :  { %2801 = vmatprep.subr.bf16.mxu0 %v3165_v3 }
 0x5f0   :  { %2803 = vmatpush3.bf16.msra.mxu0 %v3343_v7 }
 0x5f1   :  { %2810 = vmatprep.subr.bf16.mxu0 %v3165_v3 }
 0x6be   :  { %v433_v49 = vpop.f32.mrb[2].mxu0 }
 0x6bf   :  { %v434_v50 = vadd.f32 %v3362_v8, %v433_v49  ;;  %v2564_v51 = vpop.f32.mrb[3].mxu0 }
 0x6c0   :  { %v156_v51 = vld [vmem:[#allocation5 + $0x28] sm:$0xff] }
 0x6c1   :  { %445 = vrot.lane.b32.xlu0 %v434_v50, %s3168_s26  ;;  %v437_v53 = vadd.f32 %v434_v50, %v153_v52 }
 0x6c3   :  { %v2378_v54 = vmul.f32 -1.442695, %v437_v53 }
 0x6c5   :  { %2932 = vpow2.f32 %v2378_v54 }
 0x6cf   :  { %v2933_v55 = vpop.eup %2932 }
 0x6d0   :  { %v441_v56 = vadd.f32 1.0, %v2933_v55 }
 0x6d2   :  { %2934 = vrcp.f32 %v441_v56 }
 0x6dc   :  { %v2935_v57 = vpop.eup %2934 }
 0x6dd   :  { %v455_v63 = vsub.f32 1.0, %v2935_v57  ;;  %v461_v1 = vmul.f32 %v2935_v57, %v361_v47 }
 0x733   :  { %v446_v58 = vpop.permute.xlu0 %445 }
 0x734   :  { %v448_v59 = vmul.f32 %v2935_v57, %v446_v58 }
 0x736   :  { %450 = vrot.lane.b32.xlu1 %v448_v59, %s3168_s26 }
 0x7a8   :  { %v451_v60 = vpop.permute.xlu1 %450 }
 0x7a9   :  { %v453_v61 = vadd.f32 %v451_v60, %v153_v52 }
 0x7ab   :  { %2936 = vtanh.f32 %v453_v61  ;;  %v781_v61 = vld [vmem:[#allocation9] sm:$0xff] }
 0x7b5   :  { %v2937_v62 = vpop.eup %2936 }
 0x7b6   :  { %457 = vrot.lane.b32.xlu0 %v2937_v62, %s3169_s4  ;;  %v783_v62 = vld [vmem:[#allocation9 + $0x10] sm:$0xff] }
 0x828   :  { %v458_v0 = vpop.permute.xlu0 %457 }
 0x829   :  { %v460_v2 = vmul.f32 %v458_v0, %v455_v63  ;;  %v784_v0 = vld [vmem:[#allocation9 + $0x18] sm:$0xff] }
 0x82b   :  { %v462_v5 = vadd.f32 %v461_v1, %v460_v2  ;;  %v2814_v1 = vpack.c.bf16 %v784_v0, %v783_v62 }
 0x82d   :  { %464 = vrot.lane.b32.xlu1 %v462_v5, %s3169_s4 }
 0x89f   :  { %v465_v9 = vpop.permute.xlu1 %464 }
 0x8a0   :  { %2574 = vmatmul.mubr.msk.f32.vlgmr.msra.gmra.mrb[2].mxu1 %vm161_vm1, %v465_v9 }
 0x8a1   :  { %2806 = vmatpush3.bf16.msra.mxu1 %v3335_v4  ;;  %2595 = vmatprep.mubr.msk.f32.mxu1 %vm3166_vm0, %v3167_v6 }
 0x8a2   :  { %2807 = vmatprep.subr.bf16.mxu1 %v3165_v3 }
 0x8a5   :  { %2809 = vmatpush3.bf16.msra.mxu1 %v3343_v7 }
 0x8a6   :  { %2816 = vmatprep.subr.bf16.mxu1 %v3165_v3 }
 0x973   :  { %v534_v10 = vpop.f32.mrb[2].mxu1 }
 0x974   :  { %v535_v11 = vadd.f32 %v3362_v8, %v534_v10  ;;  %v2575_v12 = vpop.f32.mrb[3].mxu1 }
 0x976   :  { %546 = vrot.lane.b32.xlu0 %v535_v11, %s3168_s26  ;;  %v538_v14 = vadd.f32 %v535_v11, %v154_v13 }
 0x978   :  { %v2380_v15 = vmul.f32 -1.442695, %v538_v14  ;;  %v2372_v14 = vld [vmem:[%s3686_s6] ss:$0 sm:$0xff]  ;;  %s2419_s6 = sld [smem:[#allocation2 + $0x6]] }
 0x97a   :  { %2938 = vpow2.f32 %v2380_v15 }
 0x97e   :  { %p2252_p1 = scmp.ne.s32.totalorder %s2419_s6, 0 }
 0x980   :  { %s2253_s15 = scalar_select %p2252_p1, 1, 0 }
 0x984   :  { %v2939_v4 = vpop.eup %2938 }
 0x985   :  { %v542_v16 = vadd.f32 1.0, %v2939_v4 }
 0x987   :  { %2940 = vrcp.f32 %v542_v16 }
 0x991   :  { %v2941_v17 = vpop.eup %2940 }
 0x992   :  { %v556_v22 = vsub.f32 1.0, %v2941_v17  ;;  %v562_v24 = vmul.f32 %v2941_v17, %v462_v5 }
 0x9e8   :  { %v547_v18 = vpop.permute.xlu0 %546 }
 0x9e9   :  { %v549_v19 = vmul.f32 %v2941_v17, %v547_v18  ;;  %v3436_v17 = vld [vmem:[#allocation6] sm:$0xff] }
 0x9eb   :  { %551 = vrot.lane.b32.xlu1 %v549_v19, %s3168_s26 }
 0xa5d   :  { %v552_v7 = vpop.permute.xlu1 %551 }
 0xa5e   :  { %v554_v20 = vadd.f32 %v552_v7, %v154_v13 }
 0xa60   :  { %2942 = vtanh.f32 %v554_v20 }
 0xa6a   :  { %v2943_v21 = vpop.eup %2942 }
 0xa6b   :  { %558 = vrot.lane.b32.xlu0 %v2943_v21, %s3169_s4 }
 0xadd   :  { %v559_v23 = vpop.permute.xlu0 %558 }
 0xade   :  { %v561_v25 = vmul.f32 %v559_v23, %v556_v22 }
 0xae0   :  { %v563_v26 = vadd.f32 %v562_v24, %v561_v25 }
 0xae2   :  { %565 = vrot.lane.b32.xlu1 %v563_v26, %s3169_s4 }
 0xb54   :  { %v566_v27 = vpop.permute.xlu1 %565 }
 0xb55   :  { %2585 = vmatmul.mubr.msk.f32.vlgmr.msra.gmra.mrb[4].mxu0 %vm161_vm1, %v566_v27  ;;  %v778_v27 = vld [vmem:[#allocation12 + $0x8] sm:$0xff] }
 0xb56   :  { %2606 = vmatprep.mubr.msk.f32.mxu0 %vm3166_vm0, %v3167_v6 }
 0xc28   :  { %v635_v28 = vpop.f32.mrb[4].mxu0 }
 0xc29   :  { %v636_v29 = vadd.f32 %v3362_v8, %v635_v28  ;;  %v2586_v30 = vpop.f32.mrb[5].mxu0  ;;  %v779_v28 = vld [vmem:[#allocation12 + $0x10] sm:$0xff] }
 0xc2a   :  { %v780_v30 = vld [vmem:[#allocation12 + $0x18] sm:$0xff] }
 0xc2b   :  { %647 = vrot.lane.b32.xlu0 %v636_v29, %s3168_s26  ;;  %v639_v32 = vadd.f32 %v636_v29, %v155_v31 }
 0xc2d   :  { %v2382_v33 = vmul.f32 -1.442695, %v639_v32 }
 0xc2f   :  { %2944 = vpow2.f32 %v2382_v33 }
 0xc39   :  { %v2945_v34 = vpop.eup %2944 }
 0xc3a   :  { %v643_v35 = vadd.f32 1.0, %v2945_v34 }
 0xc3c   :  { %2946 = vrcp.f32 %v643_v35 }
 0xc46   :  { %v2947_v36 = vpop.eup %2946 }
 0xc47   :  { %v657_v42 = vsub.f32 1.0, %v2947_v36  ;;  %v663_v44 = vmul.f32 %v2947_v36, %v563_v26  ;;  %v777_v26 = vld [vmem:[#allocation12] sm:$0xff] }
 0xc48   :  { %v3445_v29 = vpack.c.bf16 %v778_v27, %v777_v26 }
 0xc9d   :  { %v648_v37 = vpop.permute.xlu0 %647 }
 0xc9e   :  { %v650_v38 = vmul.f32 %v2947_v36, %v648_v37 }
 0xca0   :  { %652 = vrot.lane.b32.xlu1 %v650_v38, %s3168_s26 }
 0xd12   :  { %v653_v39 = vpop.permute.xlu1 %652 }
 0xd13   :  { %v655_v40 = vadd.f32 %v653_v39, %v155_v31  ;;  %v3448_v31 = vpack.c.bf16 %v780_v30, %v779_v28  ;;  %v3466_v39 = vld [vmem:[%s3689_s9] ss:$0 sm:$0xff]  ;;  %s1057_s9 = sld [smem:[#allocation2]] }
 0xd15   :  { %2948 = vtanh.f32 %v655_v40 }
 0xd19   :  { %p1058_p9 = scmp.ne.s32.totalorder %s1057_s9, 0 }
 0xd1b   :  { %s1059_s2 = scalar_select %p1058_p9, 1, 0 }
 0xd1f   :  { %v2949_v41 = vpop.eup %2948 }
 0xd20   :  { %659 = vrot.lane.b32.xlu0 %v2949_v41, %s3169_s4 }
 0xd92   :  { %v660_v43 = vpop.permute.xlu0 %659 }
 0xd93   :  { %v662_v45 = vmul.f32 %v660_v43, %v657_v42 }
 0xd95   :  { %v664_v46 = vadd.f32 %v663_v44, %v662_v45  ;;  %v149_v44 = vlaneseq }
 0xd97   :  { %666 = vrot.lane.b32.xlu1 %v664_v46, %s3169_s4  ;;  %v3474_v45 = vand.u32 127, %v149_v44 }
 0xe09   :  { %v667_v47 = vpop.permute.xlu1 %666 }
 0xe0a   :  { %2596 = vmatmul.mubr.msk.f32.vlgmr.msra.gmra.mrb[4].mxu1 %vm161_vm1, %v667_v47 }
 0xe0b   :  { %2617 = vmatprep.mubr.msk.f32.mxu1 %vm3166_vm0, %v3167_v6  ;;  %2818 = vmatpush3.bf16.msra.mxu1 %v3445_v29 }
 0xe0c   :  { %2819 = vmatprep.subr.bf16.mxu1 %v3165_v3 }
 0xe0f   :  { %2821 = vmatpush3.bf16.msra.mxu1 %v3448_v31 }
 0xe10   :  { %2828 = vmatprep.subr.bf16.mxu1 %v3165_v3 }
 0xedd   :  { %v736_v48 = vpop.f32.mrb[4].mxu1 }
 0xede   :  { %v737_v49 = vadd.f32 %v3362_v8, %v736_v48  ;;  %v2597_v50 = vpop.f32.mrb[5].mxu1  ;;  %v782_v8 = vld [vmem:[#allocation9 + $0x8] sm:$0xff] }
 0xedf   :  { %v2811_v63 = vpack.c.bf16 %v782_v8, %v781_v61 }
 0xee0   :  { %748 = vrot.lane.b32.xlu0 %v737_v49, %s3168_s26  ;;  %v740_v52 = vadd.f32 %v737_v49, %v156_v51 }
 0xee1   :  { %2812 = vmatpush3.bf16.msra.mxu0 %v2811_v63 }
 0xee2   :  { %v2384_v53 = vmul.f32 -1.442695, %v740_v52  ;;  %2813 = vmatprep.subr.bf16.mxu0 %v3165_v3  ;;  %v774_v52 = vld [vmem:[#allocation11 + $0x8] sm:$0xff] }
 0xee4   :  { %2950 = vpow2.f32 %v2384_v53 }
 0xee5   :  { %2815 = vmatpush3.bf16.msra.mxu0 %v2814_v1 }
 0xee6   :  { %2822 = vmatprep.subr.bf16.mxu0 %v3165_v3 }
 0xeee   :  { %v2951_v54 = vpop.eup %2950 }
 0xeef   :  { %v744_v55 = vadd.f32 1.0, %v2951_v54 }
 0xef1   :  { %2952 = vrcp.f32 %v744_v55 }
 0xefb   :  { %v2953_v56 = vpop.eup %2952 }
 0xefc   :  { %v758_v5 = vsub.f32 1.0, %v2953_v56  ;;  %v764_v10 = vmul.f32 %v2953_v56, %v664_v46 }
 0xf52   :  { %v749_v57 = vpop.permute.xlu0 %748 }
 0xf53   :  { %v751_v58 = vmul.f32 %v2953_v56, %v749_v57 }
 0xf55   :  { %753 = vrot.lane.b32.xlu1 %v751_v58, %s3168_s26  ;;  %v775_v58 = vld [vmem:[#allocation11 + $0x10] sm:$0xff] }
 0xfc7   :  { %v754_v59 = vpop.permute.xlu1 %753 }
 0xfc8   :  { %v756_v60 = vadd.f32 %v754_v59, %v156_v51  ;;  %v773_v51 = vld [vmem:[#allocation11] sm:$0xff]  ;;  %v776_v59 = vld [vmem:[#allocation11 + $0x18] sm:$0xff] }
 0xfc9   :  { %v3478_v53 = vpack.c.bf16 %v774_v52, %v773_v51  ;;  %v767_v51 = vld [vmem:[#allocation6 + $0x8] sm:$0xff] }
 0xfca   :  { %2954 = vtanh.f32 %v756_v60  ;;  %v3482_v60 = vpack.c.bf16 %v776_v59, %v775_v58 }
 0xfd4   :  { %v2955_v2 = vpop.eup %2954 }
 0xfd5   :  { %760 = vrot.lane.b32.xlu0 %v2955_v2, %s3169_s4  ;;  %v1060_v2 = vstv %s1059_s2 }
 0xfd6   :  { %vm1061_vm5 = vcmp.eq.s32.totalorder %v1060_v2, 1 }
0x1047   :  { %v761_v9 = vpop.permute.xlu0 %760 }
0x1048   :  { %v763_v11 = vmul.f32 %v761_v9, %v758_v5 }
0x104a   :  { %v3422_v12 = vadd.f32 %v764_v10, %v763_v11 }
0x104c   :  { %786 = vrot.lane.b32.xlu1 %v3422_v12, %s3169_s4 }
0x10be   :  { %v787_v13 = vpop.permute.xlu1 %786 }
0x10bf   :  { %2607 = vmatmul.mubr.msk.f32.vlgmr.msra.gmra.mrb[6].mxu0 %vm161_vm1, %v787_v13 }
0x10c0   :  { %2628 = vmatprep.mubr.msk.f32.mxu0 %vm3166_vm0, %v3167_v6  ;;  %2824 = vmatpush3.bf16.msra.mxu0 %v3478_v53 }
0x10c1   :  { %2825 = vmatprep.subr.bf16.mxu0 %v3165_v3 }
0x10c4   :  { %2827 = vmatpush3.bf16.msra.mxu0 %v3482_v60 }
0x10c5   :  { %2834 = vmatprep.subr.bf16.mxu0 %v3165_v3 }
0x1192   :  { %v856_v15 = vpop.f32.mrb[6].mxu0 }
0x1193   :  { %v3432_v4 = vadd.f32 %v2372_v14, %v856_v15  ;;  %v2608_v16 = vpop.f32.mrb[7].mxu0 }
0x1195   :  { %868 = vrot.lane.b32.xlu0 %v3432_v4, %s3168_s26  ;;  %v860_v18 = vadd.f32 %v3432_v4, %v3436_v17 }
0x1197   :  { %v2386_v19 = vmul.f32 -1.442695, %v860_v18 }
0x1199   :  { %2956 = vpow2.f32 %v2386_v19 }
0x11a3   :  { %v2957_v7 = vpop.eup %2956 }
0x11a4   :  { %v864_v20 = vadd.f32 1.0, %v2957_v7 }
0x11a6   :  { %2958 = vrcp.f32 %v864_v20 }
0x11b0   :  { %v2959_v21 = vpop.eup %2958 }
0x11b1   :  { %v878_v33 = vsub.f32 1.0, %v2959_v21  ;;  %v884_v35 = vmul.f32 %v2959_v21, %v3422_v12 }
0x1207   :  { %v3440_v22 = vpop.permute.xlu0 %868 }
0x1208   :  { %v871_v23 = vmul.f32 %v2959_v21, %v3440_v22 }
0x120a   :  { %873 = vrot.lane.b32.xlu1 %v871_v23, %s3168_s26 }
0x127c   :  { %v874_v24 = vpop.permute.xlu1 %873 }
0x127d   :  { %v876_v25 = vadd.f32 %v874_v24, %v3436_v17 }
0x127f   :  { %2960 = vtanh.f32 %v876_v25 }
0x1289   :  { %v2961_v32 = vpop.eup %2960 }
0x128a   :  { %880 = vrot.lane.b32.xlu0 %v2961_v32, %s3169_s4 }
0x12fc   :  { %v881_v34 = vpop.permute.xlu0 %880 }
0x12fd   :  { %v883_v36 = vmul.f32 %v881_v34, %v878_v33 }
0x12ff   :  { %v885_v37 = vadd.f32 %v884_v35, %v883_v36 }
0x1301   :  { %887 = vrot.lane.b32.xlu1 %v885_v37, %s3169_s4 }
0x1373   :  { %v888_v38 = vpop.permute.xlu1 %887 }
0x1374   :  { %2618 = vmatmul.mubr.msk.f32.vlgmr.msra.gmra.mrb[6].mxu1 %vm161_vm1, %v888_v38 }
0x1375   :  { %2830 = vmatpush3.bf16.msra.mxu1 %v3445_v29  ;;  %2639 = vmatprep.mubr.msk.f32.mxu1 %vm3166_vm0, %v3167_v6 }
0x1376   :  { %2831 = vmatprep.subr.bf16.mxu1 %v3165_v3 }
0x1379   :  { %2833 = vmatpush3.bf16.msra.mxu1 %v3448_v31 }
0x137a   :  { %2840 = vmatprep.subr.bf16.mxu1 %v3165_v3 }
0x1447   :  { %v957_v40 = vpop.f32.mrb[6].mxu1 }
0x1448   :  { %v958_v41 = vadd.f32 %v3466_v39, %v957_v40  ;;  %v2619_v42 = vpop.f32.mrb[7].mxu1 }
0x144a   :  { %2354 = vst.msk [vmem:[%s3690_s10] sm:$0xff] %vm161_vm1, %v958_v41  ;;  %v961_v43 = vsel %vm161_vm1, %v958_v41, -inf }
0x144b   :  { %962 = vmax.xlane.f32.xlu0 %v961_v43 }
0x14d8   :  { %v963_v46 = vpop.xlane.xlu0 %962 }
0x14d9   :  { %vm964_vm2 = vcmp.ge.f32.partialorder %v958_v41, %v963_v46 }
0x14da   :  { %v965_v47 = vsel %vm964_vm2, %v3474_v45, 32 }
0x14db   :  { %v966_v48 = vsel %vm161_vm1, %v965_v47, 2147483647 }
0x14dc   :  { %v968_v49 = vshra.s32 %v966_v48, 16  ;;  %v967_v54 = vand.u32 65535, %v966_v48 }
0x14de   :  { %v970_v50 = vcvt.s32.f32 %v968_v49  ;;  %v969_v56 = vcvt.s32.f32 %v967_v54 }
0x14e0   :  { %971 = vmin.xlane.f32.xlu1 %v970_v50 }
0x156d   :  { %v972_v55 = vpop.xlane.xlu1 %971 }
0x156e   :  { %vm973_vm3 = vcmp.eq.f32.partialorder %v970_v50, %v972_v55  ;;  %v978_v61 = vcvt.f32.s32 %v972_v55  ;;  %v1259_v50 = vstv %s1258_s20 }
0x156f   :  { %v974_v57 = vsel %vm973_vm3, %v969_v56, inf  ;;  %vm1260_vm9 = vcmp.eq.s32.totalorder %v1259_v50, 1 }
0x1570   :  { %975 = vmin.xlane.f32.xlu0 %v974_v57  ;;  %v979_v62 = vshll.u32 %v978_v61, 16 }
0x15fd   :  { %v976_v8 = vpop.xlane.xlu0 %975 }
0x15fe   :  { %v977_v63 = vcvt.f32.s32 %v976_v8 }
0x1600   :  { %v980_v0 = vadd.s32 %v979_v62, %v977_v63 }
0x1602   :  { %vm981_vm4 = vcmp.eq.s32.totalorder %v3474_v45, %v980_v0 }
0x1603   :  { %v2388_v1 = vsel %vm981_vm4, 1.0, %v3167_v6 }
0x1604   :  { %2629 = vmatmul.mubr.msk.f32.vlgmr.msra.gmra.mrb[8].mxu0 %vm161_vm1, %v2388_v1 }
0x1605   :  { %2836 = vmatpush3.bf16.msra.mxu0 %v3478_v53  ;;  %2650 = vmatprep.mubr.msk.f32.mxu0 %vm3166_vm0, %v3167_v6 }
0x1606   :  { %2837 = vmatprep.subr.bf16.mxu0 %v3165_v3 }
0x1609   :  { %2839 = vmatpush3.bf16.msra.mxu0 %v3482_v60 }
0x160a   :  { %2846 = vmatprep.subr.bf16.mxu0 %v3165_v3 }
0x16d7   :  { %v1053_v5 = vpop.f32.mrb[8].mxu0 }
0x16d8   :  { %v1062_v9 = vsel %vm1061_vm5, %v3436_v17, %v1053_v5  ;;  %v2630_v10 = vpop.f32.mrb[9].mxu0 }
0x16d9   :  { %v1063_v11 = vadd.f32 %v1062_v9, %v3432_v4 }
0x16db   :  { %v2390_v13 = vmul.f32 -1.442695, %v1063_v11 }
0x16dd   :  { %2962 = vpow2.f32 %v2390_v13 }
0x16e7   :  { %v2963_v14 = vpop.eup %2962 }
0x16e8   :  { %v1067_v15 = vadd.f32 1.0, %v2963_v14 }
0x16ea   :  { %2964 = vrcp.f32 %v1067_v15 }
0x16f4   :  { %v2965_v16 = vpop.eup %2964 }
0x16f5   :  { %v1070_v18 = vmul.f32 %v2965_v16, %v3440_v22  ;;  %v1077_v17 = vsub.f32 1.0, %v2965_v16  ;;  %v1083_v23 = vmul.f32 %v2965_v16, %v3422_v12 }
0x16f7   :  { %1072 = vrot.lane.b32.xlu0 %v1070_v18, %s3168_s26 }
0x1769   :  { %v1073_v19 = vpop.permute.xlu0 %1072 }
0x176a   :  { %v1075_v7 = vadd.f32 %v1073_v19, %v1062_v9 }
0x176c   :  { %2966 = vtanh.f32 %v1075_v7 }
0x1776   :  { %v2967_v20 = vpop.eup %2966 }
0x1777   :  { %1079 = vrot.lane.b32.xlu1 %v2967_v20, %s3169_s4 }
0x17e9   :  { %v1080_v21 = vpop.permute.xlu1 %1079 }
0x17ea   :  { %v1082_v24 = vmul.f32 %v1080_v21, %v1077_v17 }
0x17ec   :  { %v1084_v25 = vadd.f32 %v1083_v23, %v1082_v24 }
0x17ee   :  { %1086 = vrot.lane.b32.xlu1 %v1084_v25, %s3169_s4 }
0x1860   :  { %v1087_v26 = vpop.permute.xlu1 %1086 }
0x1861   :  { %2640 = vmatmul.mubr.msk.f32.vlgmr.msra.gmra.mrb[8].mxu1 %vm161_vm1, %v1087_v26 }
0x1862   :  { %2842 = vmatpush3.bf16.msra.mxu1 %v3445_v29  ;;  %2661 = vmatprep.mubr.msk.f32.mxu1 %vm3166_vm0, %v3167_v6 }
0x1863   :  { %2843 = vmatprep.subr.bf16.mxu1 %v3165_v3 }
0x1866   :  { %2845 = vmatpush3.bf16.msra.mxu1 %v3448_v31 }
0x1867   :  { %2852 = vmatprep.subr.bf16.mxu1 %v3165_v3 }
0x1934   :  { %v1156_v27 = vpop.f32.mrb[8].mxu1 }
0x1935   :  { %v1157_v28 = vadd.f32 %v3466_v39, %v1156_v27  ;;  %v2641_v30 = vpop.f32.mrb[9].mxu1 }
0x1937   :  { %2355 = vst.msk [vmem:[%s3690_s10 + $0x8] sm:$0xff] %vm161_vm1, %v1157_v28  ;;  %v1160_v32 = vsel %vm161_vm1, %v1157_v28, -inf }
0x1938   :  { %1161 = vmax.xlane.f32.xlu0 %v1160_v32 }
0x19c5   :  { %v1162_v33 = vpop.xlane.xlu0 %1161 }
0x19c6   :  { %vm1163_vm6 = vcmp.ge.f32.partialorder %v1157_v28, %v1162_v33 }
0x19c7   :  { %v1164_v34 = vsel %vm1163_vm6, %v3474_v45, 32 }
0x19c8   :  { %v1165_v35 = vsel %vm161_vm1, %v1164_v34, 2147483647  ;;  %v1458_v34 = vstv %s1457_s22 }
0x19c9   :  { %v1167_v36 = vshra.s32 %v1165_v35, 16  ;;  %v1166_v38 = vand.u32 65535, %v1165_v35  ;;  %v768_v35 = vld [vmem:[#allocation6 + $0x10] sm:$0xff]  ;;  %vm1459_vm13 = vcmp.eq.s32.totalorder %v1458_v34, 1 }
0x19cb   :  { %v1169_v37 = vcvt.s32.f32 %v1167_v36  ;;  %v1168_v41 = vcvt.s32.f32 %v1166_v38 }
0x19cd   :  { %1170 = vmin.xlane.f32.xlu1 %v1169_v37 }
0x1a5a   :  { %v1171_v40 = vpop.xlane.xlu1 %1170 }
0x1a5b   :  { %vm1172_vm7 = vcmp.eq.f32.partialorder %v1169_v37, %v1171_v40  ;;  %v1177_v43 = vcvt.f32.s32 %v1171_v40 }
0x1a5c   :  { %v1173_v42 = vsel %vm1172_vm7, %v1168_v41, inf }
0x1a5d   :  { %1174 = vmin.xlane.f32.xlu0 %v1173_v42  ;;  %v1178_v46 = vshll.u32 %v1177_v43, 16 }
0x1aea   :  { %v1175_v44 = vpop.xlane.xlu0 %1174 }
0x1aeb   :  { %v1176_v47 = vcvt.f32.s32 %v1175_v44 }
0x1aed   :  { %v1179_v48 = vadd.s32 %v1178_v46, %v1176_v47 }
0x1aef   :  { %vm1180_vm8 = vcmp.eq.s32.totalorder %v3474_v45, %v1179_v48 }
0x1af0   :  { %v2392_v49 = vsel %vm1180_vm8, 1.0, %v3167_v6 }
0x1af1   :  { %2651 = vmatmul.mubr.msk.f32.vlgmr.msra.gmra.mrb[10].mxu0 %vm161_vm1, %v2392_v49 }
0x1af2   :  { %2848 = vmatpush3.bf16.msra.mxu0 %v3478_v53  ;;  %2672 = vmatprep.mubr.msk.f32.mxu0 %vm3166_vm0, %v3167_v6 }
0x1af3   :  { %2849 = vmatprep.subr.bf16.mxu0 %v3165_v3 }
0x1af6   :  { %2851 = vmatpush3.bf16.msra.mxu0 %v3482_v60 }
0x1af7   :  { %2858 = vmatprep.subr.bf16.mxu0 %v3165_v3 }
0x1bc4   :  { %v1252_v52 = vpop.f32.mrb[10].mxu0 }
0x1bc5   :  { %v1261_v54 = vsel %vm1260_vm9, %v767_v51, %v1252_v52  ;;  %v2652_v55 = vpop.f32.mrb[11].mxu0 }
0x1bc6   :  { %v1262_v56 = vadd.f32 %v1261_v54, %v3432_v4 }
0x1bc8   :  { %v2395_v57 = vmul.f32 -1.442695, %v1262_v56 }
0x1bca   :  { %2968 = vpow2.f32 %v2395_v57 }
0x1bd4   :  { %v2969_v58 = vpop.eup %2968 }
0x1bd5   :  { %v1266_v59 = vadd.f32 1.0, %v2969_v58 }
0x1bd7   :  { %2970 = vrcp.f32 %v1266_v59 }
0x1be1   :  { %v2971_v61 = vpop.eup %2970 }
0x1be2   :  { %v1269_v8 = vmul.f32 %v2971_v61, %v3440_v22  ;;  %v1276_v1 = vsub.f32 1.0, %v2971_v61  ;;  %v1282_v5 = vmul.f32 %v2971_v61, %v3422_v12 }
0x1be4   :  { %1271 = vrot.lane.b32.xlu0 %v1269_v8, %s3168_s26 }
0x1c56   :  { %v1272_v62 = vpop.permute.xlu0 %1271 }
0x1c57   :  { %v1274_v63 = vadd.f32 %v1272_v62, %v1261_v54 }
0x1c59   :  { %2972 = vtanh.f32 %v1274_v63 }
0x1c63   :  { %v2973_v0 = vpop.eup %2972 }
0x1c64   :  { %1278 = vrot.lane.b32.xlu1 %v2973_v0, %s3169_s4 }
0x1cd6   :  { %v1279_v2 = vpop.permute.xlu1 %1278 }
0x1cd7   :  { %v1281_v9 = vmul.f32 %v1279_v2, %v1276_v1 }
0x1cd9   :  { %v1283_v10 = vadd.f32 %v1282_v5, %v1281_v9 }
0x1cdb   :  { %1285 = vrot.lane.b32.xlu1 %v1283_v10, %s3169_s4 }
0x1d4d   :  { %v1286_v11 = vpop.permute.xlu1 %1285 }
0x1d4e   :  { %2662 = vmatmul.mubr.msk.f32.vlgmr.msra.gmra.mrb[10].mxu1 %vm161_vm1, %v1286_v11 }
0x1d4f   :  { %2854 = vmatpush3.bf16.msra.mxu1 %v3445_v29  ;;  %2683 = vmatprep.mubr.msk.f32.mxu1 %vm3166_vm0, %v3167_v6 }
0x1d50   :  { %2855 = vmatprep.subr.bf16.mxu1 %v3165_v3 }
0x1d53   :  { %2857 = vmatpush3.bf16.msra.mxu1 %v3448_v31 }
0x1d54   :  { %2864 = vmatprep.subr.bf16.mxu1 %v3165_v3 }
0x1e21   :  { %v1355_v13 = vpop.f32.mrb[10].mxu1 }
0x1e22   :  { %v1356_v14 = vadd.f32 %v3466_v39, %v1355_v13  ;;  %v2663_v15 = vpop.f32.mrb[11].mxu1 }
0x1e24   :  { %2356 = vst.msk [vmem:[%s3690_s10 + $0x10] sm:$0xff] %vm161_vm1, %v1356_v14  ;;  %v1359_v16 = vsel %vm161_vm1, %v1356_v14, -inf }
0x1e25   :  { %1360 = vmax.xlane.f32.xlu0 %v1359_v16 }
0x1eb2   :  { %v1361_v18 = vpop.xlane.xlu0 %1360 }
0x1eb3   :  { %vm1362_vm10 = vcmp.ge.f32.partialorder %v1356_v14, %v1361_v18 }
0x1eb4   :  { %v1363_v19 = vsel %vm1362_vm10, %v3474_v45, 32 }
0x1eb5   :  { %v1364_v7 = vsel %vm161_vm1, %v1363_v19, 2147483647  ;;  %v1657_v19 = vstv %s1656_s28 }
0x1eb6   :  { %v1366_v20 = vshra.s32 %v1364_v7, 16  ;;  %v1365_v21 = vand.u32 65535, %v1364_v7  ;;  %v769_v7 = vld [vmem:[#allocation6 + $0x18] sm:$0xff]  ;;  %vm1658_vm3 = vcmp.eq.s32.totalorder %v1657_v19, 1 }
0x1eb8   :  { %v1368_v17 = vcvt.s32.f32 %v1366_v20  ;;  %v1367_v24 = vcvt.s32.f32 %v1365_v21 }
0x1eba   :  { %1369 = vmin.xlane.f32.xlu1 %v1368_v17 }
0x1f47   :  { %v1370_v23 = vpop.xlane.xlu1 %1369 }
0x1f48   :  { %vm1371_vm11 = vcmp.eq.f32.partialorder %v1368_v17, %v1370_v23  ;;  %v1376_v26 = vcvt.f32.s32 %v1370_v23 }
0x1f49   :  { %v1372_v25 = vsel %vm1371_vm11, %v1367_v24, inf }
0x1f4a   :  { %1373 = vmin.xlane.f32.xlu0 %v1372_v25  ;;  %v1377_v28 = vshll.u32 %v1376_v26, 16 }
0x1fd7   :  { %v1374_v27 = vpop.xlane.xlu0 %1373 }
0x1fd8   :  { %v1375_v30 = vcvt.f32.s32 %v1374_v27 }
0x1fda   :  { %v1378_v32 = vadd.s32 %v1377_v28, %v1375_v30 }
0x1fdc   :  { %vm1379_vm12 = vcmp.eq.s32.totalorder %v3474_v45, %v1378_v32 }
0x1fdd   :  { %v2397_v33 = vsel %vm1379_vm12, 1.0, %v3167_v6 }
0x1fde   :  { %2673 = vmatmul.mubr.msk.f32.vlgmr.msra.gmra.mrb[12].mxu0 %vm161_vm1, %v2397_v33 }
0x1fdf   :  { %2860 = vmatpush3.bf16.msra.mxu0 %v3478_v53  ;;  %2694 = vmatprep.mubr.msk.f32.mxu0 %vm3166_vm0, %v3167_v6 }
0x1fe0   :  { %2861 = vmatprep.subr.bf16.mxu0 %v3165_v3 }
0x1fe3   :  { %2863 = vmatpush3.bf16.msra.mxu0 %v3482_v60 }
0x1fe4   :  { %2870 = vmatprep.subr.bf16.mxu0 %v3165_v3 }
0x20b1   :  { %v1451_v36 = vpop.f32.mrb[12].mxu0 }
0x20b2   :  { %v1460_v37 = vsel %vm1459_vm13, %v768_v35, %v1451_v36  ;;  %v2674_v38 = vpop.f32.mrb[13].mxu0 }
0x20b3   :  { %v1461_v40 = vadd.f32 %v1460_v37, %v3432_v4 }
0x20b5   :  { %v2400_v41 = vmul.f32 -1.442695, %v1461_v40 }
0x20b7   :  { %2974 = vpow2.f32 %v2400_v41 }
0x20c1   :  { %v2975_v42 = vpop.eup %2974 }
0x20c2   :  { %v1465_v43 = vadd.f32 1.0, %v2975_v42 }
0x20c4   :  { %2976 = vrcp.f32 %v1465_v43 }
0x20ce   :  { %v2977_v44 = vpop.eup %2976 }
0x20cf   :  { %v1468_v46 = vmul.f32 %v2977_v44, %v3440_v22  ;;  %v1475_v50 = vsub.f32 1.0, %v2977_v44  ;;  %v1481_v52 = vmul.f32 %v2977_v44, %v3422_v12 }
0x20d1   :  { %1470 = vrot.lane.b32.xlu0 %v1468_v46, %s3168_s26 }
0x2143   :  { %v1471_v47 = vpop.permute.xlu0 %1470 }
0x2144   :  { %v1473_v48 = vadd.f32 %v1471_v47, %v1460_v37 }
0x2146   :  { %2978 = vtanh.f32 %v1473_v48 }
0x2150   :  { %v2979_v49 = vpop.eup %2978 }
0x2151   :  { %1477 = vrot.lane.b32.xlu1 %v2979_v49, %s3169_s4 }
0x21c3   :  { %v1478_v51 = vpop.permute.xlu1 %1477 }
0x21c4   :  { %v1480_v54 = vmul.f32 %v1478_v51, %v1475_v50 }
0x21c6   :  { %v1482_v55 = vadd.f32 %v1481_v52, %v1480_v54 }
0x21c8   :  { %1484 = vrot.lane.b32.xlu1 %v1482_v55, %s3169_s4 }
0x223a   :  { %v1485_v56 = vpop.permute.xlu1 %1484 }
0x223b   :  { %2684 = vmatmul.mubr.msk.f32.vlgmr.msra.gmra.mrb[12].mxu1 %vm161_vm1, %v1485_v56 }
0x223c   :  { %2866 = vmatpush3.bf16.msra.mxu1 %v3445_v29  ;;  %2705 = vmatprep.mubr.msk.f32.mxu1 %vm3166_vm0, %v3167_v6 }
0x223d   :  { %2867 = vmatprep.subr.bf16.mxu1 %v3165_v3 }
0x2240   :  { %2869 = vmatpush3.bf16.msra.mxu1 %v3448_v31 }
0x2241   :  { %2876 = vmatprep.subr.bf16.mxu1 %v3165_v3 }
0x230e   :  { %v1554_v57 = vpop.f32.mrb[12].mxu1 }
0x230f   :  { %v1555_v58 = vadd.f32 %v3466_v39, %v1554_v57  ;;  %v2685_v59 = vpop.f32.mrb[13].mxu1 }
0x2311   :  { %2357 = vst.msk [vmem:[%s3690_s10 + $0x18] sm:$0xff] %vm161_vm1, %v1555_v58  ;;  %v1558_v61 = vsel %vm161_vm1, %v1555_v58, -inf }
0x2312   :  { %1559 = vmax.xlane.f32.xlu0 %v1558_v61 }
0x239f   :  { %v1560_v8 = vpop.xlane.xlu0 %1559 }
0x23a0   :  { %vm1561_vm14 = vcmp.ge.f32.partialorder %v1555_v58, %v1560_v8 }
0x23a1   :  { %v1562_v62 = vsel %vm1561_vm14, %v3474_v45, 32 }
0x23a2   :  { %v1563_v63 = vsel %vm161_vm1, %v1562_v62, 2147483647  ;;  %v1856_v62 = vstv %s1855_s1 }
0x23a3   :  { %v1565_v0 = vshra.s32 %v1563_v63, 16  ;;  %v1564_v2 = vand.u32 65535, %v1563_v63  ;;  %v770_v63 = vld [vmem:[#allocation6 + $0x20] sm:$0xff]  ;;  %vm1857_vm7 = vcmp.eq.s32.totalorder %v1856_v62, 1 }
0x23a5   :  { %v1567_v1 = vcvt.s32.f32 %v1565_v0  ;;  %v1566_v9 = vcvt.s32.f32 %v1564_v2 }
0x23a7   :  { %1568 = vmin.xlane.f32.xlu1 %v1567_v1 }
0x2434   :  { %v1569_v5 = vpop.xlane.xlu1 %1568 }
0x2435   :  { %vm1570_vm15 = vcmp.eq.f32.partialorder %v1567_v1, %v1569_v5  ;;  %v1575_v11 = vcvt.f32.s32 %v1569_v5 }
0x2436   :  { %v1571_v10 = vsel %vm1570_vm15, %v1566_v9, inf }
0x2437   :  { %1572 = vmin.xlane.f32.xlu0 %v1571_v10  ;;  %v1576_v14 = vshll.u32 %v1575_v11, 16 }
0x24c4   :  { %v1573_v13 = vpop.xlane.xlu0 %1572 }
0x24c5   :  { %v1574_v15 = vcvt.f32.s32 %v1573_v13 }
0x24c7   :  { %v1577_v16 = vadd.s32 %v1576_v14, %v1574_v15 }
0x24c9   :  { %vm1578_vm2 = vcmp.eq.s32.totalorder %v3474_v45, %v1577_v16 }
0x24ca   :  { %v2402_v18 = vsel %vm1578_vm2, 1.0, %v3167_v6 }
0x24cb   :  { %2695 = vmatmul.mubr.msk.f32.vlgmr.msra.gmra.mrb[14].mxu0 %vm161_vm1, %v2402_v18 }
0x24cc   :  { %2872 = vmatpush3.bf16.msra.mxu0 %v3478_v53  ;;  %2716 = vmatprep.mubr.msk.f32.mxu0 %vm3166_vm0, %v3167_v6 }
0x24cd   :  { %2873 = vmatprep.subr.bf16.mxu0 %v3165_v3 }
0x24d0   :  { %2875 = vmatpush3.bf16.msra.mxu0 %v3482_v60 }
0x24d1   :  { %2882 = vmatprep.subr.bf16.mxu0 %v3165_v3 }
0x259e   :  { %v1650_v20 = vpop.f32.mrb[14].mxu0 }
0x259f   :  { %v1659_v17 = vsel %vm1658_vm3, %v769_v7, %v1650_v20  ;;  %v2696_v21 = vpop.f32.mrb[15].mxu0 }
0x25a0   :  { %v1660_v23 = vadd.f32 %v1659_v17, %v3432_v4 }
0x25a2   :  { %v2405_v24 = vmul.f32 -1.442695, %v1660_v23 }
0x25a4   :  { %2980 = vpow2.f32 %v2405_v24 }
0x25ae   :  { %v2981_v25 = vpop.eup %2980 }
0x25af   :  { %v1664_v26 = vadd.f32 1.0, %v2981_v25 }
0x25b1   :  { %2982 = vrcp.f32 %v1664_v26 }
0x25bb   :  { %v2983_v27 = vpop.eup %2982 }
0x25bc   :  { %v1667_v28 = vmul.f32 %v2983_v27, %v3440_v22  ;;  %v1674_v34 = vsub.f32 1.0, %v2983_v27  ;;  %v1680_v36 = vmul.f32 %v2983_v27, %v3422_v12 }
0x25be   :  { %1669 = vrot.lane.b32.xlu0 %v1667_v28, %s3168_s26 }
0x2630   :  { %v1670_v30 = vpop.permute.xlu0 %1669 }
0x2631   :  { %v1672_v32 = vadd.f32 %v1670_v30, %v1659_v17 }
0x2633   :  { %2984 = vtanh.f32 %v1672_v32 }
0x263d   :  { %v2985_v33 = vpop.eup %2984 }
0x263e   :  { %1676 = vrot.lane.b32.xlu1 %v2985_v33, %s3169_s4 }
0x26b0   :  { %v1677_v35 = vpop.permute.xlu1 %1676 }
0x26b1   :  { %v1679_v37 = vmul.f32 %v1677_v35, %v1674_v34 }
0x26b3   :  { %v1681_v38 = vadd.f32 %v1680_v36, %v1679_v37 }
0x26b5   :  { %1683 = vrot.lane.b32.xlu1 %v1681_v38, %s3169_s4 }
0x2727   :  { %v1684_v40 = vpop.permute.xlu1 %1683 }
0x2728   :  { %2706 = vmatmul.mubr.msk.f32.vlgmr.msra.gmra.mrb[14].mxu1 %vm161_vm1, %v1684_v40 }
0x2729   :  { %2878 = vmatpush3.bf16.msra.mxu1 %v3445_v29  ;;  %2727 = vmatprep.mubr.msk.f32.mxu1 %vm3166_vm0, %v3167_v6 }
0x272a   :  { %2879 = vmatprep.subr.bf16.mxu1 %v3165_v3 }
0x272d   :  { %2881 = vmatpush3.bf16.msra.mxu1 %v3448_v31 }
0x272e   :  { %2888 = vmatprep.subr.bf16.mxu1 %v3165_v3 }
0x27fb   :  { %v1753_v41 = vpop.f32.mrb[14].mxu1 }
0x27fc   :  { %v1754_v42 = vadd.f32 %v3466_v39, %v1753_v41  ;;  %v2707_v43 = vpop.f32.mrb[15].mxu1 }
0x27fe   :  { %2358 = vst.msk [vmem:[%s3690_s10 + $0x20] sm:$0xff] %vm161_vm1, %v1754_v42  ;;  %v1757_v44 = vsel %vm161_vm1, %v1754_v42, -inf }
0x27ff   :  { %1758 = vmax.xlane.f32.xlu0 %v1757_v44 }
0x288c   :  { %v1759_v46 = vpop.xlane.xlu0 %1758 }
0x288d   :  { %vm1760_vm4 = vcmp.ge.f32.partialorder %v1754_v42, %v1759_v46 }
0x288e   :  { %v1761_v47 = vsel %vm1760_vm4, %v3474_v45, 32 }
0x288f   :  { %v1762_v48 = vsel %vm161_vm1, %v1761_v47, 2147483647  ;;  %v2055_v47 = vstv %s2054_s25 }
0x2890   :  { %v1764_v49 = vshra.s32 %v1762_v48, 16  ;;  %v1763_v51 = vand.u32 65535, %v1762_v48  ;;  %v771_v48 = vld [vmem:[#allocation6 + $0x28] sm:$0xff]  ;;  %vm2056_vm11 = vcmp.eq.s32.totalorder %v2055_v47, 1 }
0x2892   :  { %v1766_v50 = vcvt.s32.f32 %v1764_v49  ;;  %v1765_v54 = vcvt.s32.f32 %v1763_v51 }
0x2894   :  { %1767 = vmin.xlane.f32.xlu1 %v1766_v50 }
0x2921   :  { %v1768_v52 = vpop.xlane.xlu1 %1767 }
0x2922   :  { %vm1769_vm5 = vcmp.eq.f32.partialorder %v1766_v50, %v1768_v52  ;;  %v1774_v56 = vcvt.f32.s32 %v1768_v52 }
0x2923   :  { %v1770_v55 = vsel %vm1769_vm5, %v1765_v54, inf }
0x2924   :  { %1771 = vmin.xlane.f32.xlu0 %v1770_v55  ;;  %v1775_v58 = vshll.u32 %v1774_v56, 16 }
0x29b1   :  { %v1772_v57 = vpop.xlane.xlu0 %1771 }
0x29b2   :  { %v1773_v59 = vcvt.f32.s32 %v1772_v57 }
0x29b4   :  { %v1776_v61 = vadd.s32 %v1775_v58, %v1773_v59 }
0x29b6   :  { %vm1777_vm6 = vcmp.eq.s32.totalorder %v3474_v45, %v1776_v61 }
0x29b7   :  { %v2407_v8 = vsel %vm1777_vm6, 1.0, %v3167_v6 }
0x29b8   :  { %2717 = vmatmul.mubr.msk.f32.vlgmr.msra.gmra.mrb[16].mxu0 %vm161_vm1, %v2407_v8 }
0x29b9   :  { %2884 = vmatpush3.bf16.msra.mxu0 %v3478_v53  ;;  %2738 = vmatprep.mubr.msk.f32.mxu0 %vm3166_vm0, %v3167_v6 }
0x29ba   :  { %2885 = vmatprep.subr.bf16.mxu0 %v3165_v3 }
0x29bd   :  { %2887 = vmatpush3.bf16.msra.mxu0 %v3482_v60 }
0x29be   :  { %2894 = vmatprep.subr.bf16.mxu0 %v3165_v3 }
0x2a8b   :  { %v1849_v0 = vpop.f32.mrb[16].mxu0 }
0x2a8c   :  { %v1858_v1 = vsel %vm1857_vm7, %v770_v63, %v1849_v0  ;;  %v2718_v2 = vpop.f32.mrb[17].mxu0 }
0x2a8d   :  { %v1859_v5 = vadd.f32 %v1858_v1, %v3432_v4 }
0x2a8f   :  { %v2410_v9 = vmul.f32 -1.442695, %v1859_v5 }
0x2a91   :  { %2986 = vpow2.f32 %v2410_v9 }
0x2a9b   :  { %v2987_v10 = vpop.eup %2986 }
0x2a9c   :  { %v1863_v11 = vadd.f32 1.0, %v2987_v10 }
0x2a9e   :  { %2988 = vrcp.f32 %v1863_v11 }
0x2aa8   :  { %v2989_v13 = vpop.eup %2988 }
0x2aa9   :  { %v1866_v14 = vmul.f32 %v2989_v13, %v3440_v22  ;;  %v1873_v19 = vsub.f32 1.0, %v2989_v13  ;;  %v1879_v20 = vmul.f32 %v2989_v13, %v3422_v12 }
0x2aab   :  { %1868 = vrot.lane.b32.xlu0 %v1866_v14, %s3168_s26 }
0x2b1d   :  { %v1869_v15 = vpop.permute.xlu0 %1868 }
0x2b1e   :  { %v1871_v16 = vadd.f32 %v1869_v15, %v1858_v1 }
0x2b20   :  { %2990 = vtanh.f32 %v1871_v16 }
0x2b2a   :  { %v2991_v18 = vpop.eup %2990 }
0x2b2b   :  { %1875 = vrot.lane.b32.xlu1 %v2991_v18, %s3169_s4 }
0x2b9d   :  { %v1876_v7 = vpop.permute.xlu1 %1875 }
0x2b9e   :  { %v1878_v17 = vmul.f32 %v1876_v7, %v1873_v19 }
0x2ba0   :  { %v1880_v21 = vadd.f32 %v1879_v20, %v1878_v17 }
0x2ba2   :  { %1882 = vrot.lane.b32.xlu1 %v1880_v21, %s3169_s4 }
0x2c14   :  { %v1883_v23 = vpop.permute.xlu1 %1882 }
0x2c15   :  { %2728 = vmatmul.mubr.msk.f32.vlgmr.msra.gmra.mrb[16].mxu1 %vm161_vm1, %v1883_v23 }
0x2c16   :  { %2890 = vmatpush3.bf16.msra.mxu1 %v3445_v29  ;;  %2749 = vmatprep.mubr.msk.f32.mxu1 %vm3166_vm0, %v3167_v6 }
0x2c17   :  { %2891 = vmatprep.subr.bf16.mxu1 %v3165_v3 }
0x2c1a   :  { %2893 = vmatpush3.bf16.msra.mxu1 %v3448_v31 }
0x2c1b   :  { %2900 = vmatprep.subr.bf16.mxu1 %v3165_v3 }
0x2ce8   :  { %v1952_v24 = vpop.f32.mrb[16].mxu1 }
0x2ce9   :  { %v1953_v25 = vadd.f32 %v3466_v39, %v1952_v24  ;;  %v2729_v26 = vpop.f32.mrb[17].mxu1  ;;  %v2254_v24 = vstv %s2253_s15 }
0x2cea   :  { %vm2255_vm14 = vcmp.eq.s32.totalorder %v2254_v24, 1 }
0x2ceb   :  { %2359 = vst.msk [vmem:[%s3690_s10 + $0x28] sm:$0xff] %vm161_vm1, %v1953_v25  ;;  %v1956_v27 = vsel %vm161_vm1, %v1953_v25, -inf }
0x2cec   :  { %1957 = vmax.xlane.f32.xlu0 %v1956_v27 }
0x2d79   :  { %v1958_v28 = vpop.xlane.xlu0 %1957 }
0x2d7a   :  { %vm1959_vm8 = vcmp.ge.f32.partialorder %v1953_v25, %v1958_v28  ;;  %v772_v25 = vld [vmem:[#allocation6 + $0x30] sm:$0xff] }
0x2d7b   :  { %v1960_v30 = vsel %vm1959_vm8, %v3474_v45, 32 }
0x2d7c   :  { %v1961_v32 = vsel %vm161_vm1, %v1960_v30, 2147483647 }
0x2d7d   :  { %v1963_v33 = vshra.s32 %v1961_v32, 16  ;;  %v1962_v35 = vand.u32 65535, %v1961_v32 }
0x2d7f   :  { %v1965_v34 = vcvt.s32.f32 %v1963_v33  ;;  %v1964_v37 = vcvt.s32.f32 %v1962_v35 }
0x2d81   :  { %1966 = vmin.xlane.f32.xlu1 %v1965_v34 }
0x2e0e   :  { %v1967_v36 = vpop.xlane.xlu1 %1966 }
0x2e0f   :  { %vm1968_vm9 = vcmp.eq.f32.partialorder %v1965_v34, %v1967_v36  ;;  %v1973_v40 = vcvt.f32.s32 %v1967_v36 }
0x2e10   :  { %v1969_v38 = vsel %vm1968_vm9, %v1964_v37, inf }
0x2e11   :  { %1970 = vmin.xlane.f32.xlu0 %v1969_v38  ;;  %v1974_v42 = vshll.u32 %v1973_v40, 16 }
0x2e9e   :  { %v1971_v41 = vpop.xlane.xlu0 %1970 }
0x2e9f   :  { %v1972_v43 = vcvt.f32.s32 %v1971_v41 }
0x2ea1   :  { %v1975_v44 = vadd.s32 %v1974_v42, %v1972_v43 }
0x2ea3   :  { %vm1976_vm10 = vcmp.eq.s32.totalorder %v3474_v45, %v1975_v44 }
0x2ea4   :  { %v2412_v46 = vsel %vm1976_vm10, 1.0, %v3167_v6 }
0x2ea5   :  { %2739 = vmatmul.mubr.msk.f32.vlgmr.msra.gmra.mrb[18].mxu0 %vm161_vm1, %v2412_v46 }
0x2ea6   :  { %2896 = vmatpush3.bf16.msra.mxu0 %v3478_v53  ;;  %2760 = vmatprep.mubr.msk.f32.mxu0 %vm3166_vm0, %v3167_v6 }
0x2ea7   :  { %2897 = vmatprep.subr.bf16.mxu0 %v3165_v3 }
0x2eaa   :  { %2899 = vmatpush3.bf16.msra.mxu0 %v3482_v60 }
0x2f78   :  { %v2048_v49 = vpop.f32.mrb[18].mxu0 }
0x2f79   :  { %v2057_v50 = vsel %vm2056_vm11, %v771_v48, %v2048_v49  ;;  %v2740_v51 = vpop.f32.mrb[19].mxu0 }
0x2f7a   :  { %v2058_v52 = vadd.f32 %v2057_v50, %v3432_v4 }
0x2f7c   :  { %v2415_v54 = vmul.f32 -1.442695, %v2058_v52 }
0x2f7e   :  { %2992 = vpow2.f32 %v2415_v54 }
0x2f88   :  { %v2993_v53 = vpop.eup %2992 }
0x2f89   :  { %v2062_v55 = vadd.f32 1.0, %v2993_v53 }
0x2f8b   :  { %2994 = vrcp.f32 %v2062_v55 }
0x2f95   :  { %v2995_v56 = vpop.eup %2994 }
0x2f96   :  { %v2065_v57 = vmul.f32 %v2995_v56, %v3440_v22  ;;  %v2072_v61 = vsub.f32 1.0, %v2995_v56  ;;  %v2078_v62 = vmul.f32 %v2995_v56, %v3422_v12 }
0x2f98   :  { %2067 = vrot.lane.b32.xlu0 %v2065_v57, %s3168_s26 }
0x300a   :  { %v2068_v60 = vpop.permute.xlu0 %2067 }
0x300b   :  { %v2070_v58 = vadd.f32 %v2068_v60, %v2057_v50 }
0x300d   :  { %2996 = vtanh.f32 %v2070_v58 }
0x3017   :  { %v2997_v59 = vpop.eup %2996 }
0x3018   :  { %2074 = vrot.lane.b32.xlu1 %v2997_v59, %s3169_s4 }
0x308a   :  { %v2075_v8 = vpop.permute.xlu1 %2074 }
0x308b   :  { %v2077_v63 = vmul.f32 %v2075_v8, %v2072_v61 }
0x308d   :  { %v2079_v0 = vadd.f32 %v2078_v62, %v2077_v63 }
0x308f   :  { %2081 = vrot.lane.b32.xlu1 %v2079_v0, %s3169_s4 }
0x3101   :  { %v2082_v1 = vpop.permute.xlu1 %2081 }
0x3102   :  { %2750 = vmatmul.mubr.msk.f32.vlgmr.msra.gmra.mrb[18].mxu1 %vm161_vm1, %v2082_v1 }
0x3103   :  { %2902 = vmatpush3.bf16.msra.mxu1 %v3445_v29  ;;  %2771 = vmatprep.mubr.msk.f32.mxu1 %vm3166_vm0, %v3167_v6 }
0x3104   :  { %2903 = vmatprep.subr.bf16.mxu1 %v3165_v3 }
0x3107   :  { %2905 = vmatpush3.bf16.msra.mxu1 %v3448_v31 }
0x31d5   :  { %v2151_v2 = vpop.f32.mrb[18].mxu1 }
0x31d6   :  { %v2152_v5 = vadd.f32 %v3466_v39, %v2151_v2  ;;  %v2751_v9 = vpop.f32.mrb[19].mxu1 }
0x31d8   :  { %2360 = vst.msk [vmem:[%s3690_s10 + $0x30] sm:$0xff] %vm161_vm1, %v2152_v5  ;;  %v2155_v10 = vsel %vm161_vm1, %v2152_v5, -inf }
0x31d9   :  { %2156 = vmax.xlane.f32.xlu0 %v2155_v10 }
0x3266   :  { %v2157_v29 = vpop.xlane.xlu0 %2156 }
0x3267   :  { %vm2158_vm12 = vcmp.ge.f32.partialorder %v2152_v5, %v2157_v29 }
0x3268   :  { %v2159_v11 = vsel %vm2158_vm12, %v3474_v45, 32 }
0x3269   :  { %v2160_v3 = vsel %vm161_vm1, %v2159_v11, 2147483647 }
0x326a   :  { %v2162_v13 = vshra.s32 %v2160_v3, 16  ;;  %v2161_v14 = vand.u32 65535, %v2160_v3 }
0x326c   :  { %v2164_v31 = vcvt.s32.f32 %v2162_v13  ;;  %v2163_v16 = vcvt.s32.f32 %v2161_v14 }
0x326e   :  { %2165 = vmin.xlane.f32.xlu1 %v2164_v31 }
0x32fb   :  { %v2166_v15 = vpop.xlane.xlu1 %2165 }
0x32fc   :  { %vm2167_vm0 = vcmp.eq.f32.partialorder %v2164_v31, %v2166_v15  ;;  %v2172_v19 = vcvt.f32.s32 %v2166_v15 }
0x32fd   :  { %v2168_v18 = vsel %vm2167_vm0, %v2163_v16, inf }
0x32fe   :  { %2169 = vmin.xlane.f32.xlu0 %v2168_v18  ;;  %v2173_v20 = vshll.u32 %v2172_v19, 16 }
0x338b   :  { %v2170_v7 = vpop.xlane.xlu0 %2169 }
0x338c   :  { %v2171_v17 = vcvt.f32.s32 %v2170_v7 }
0x338e   :  { %v2174_v21 = vadd.s32 %v2173_v20, %v2171_v17 }
0x3390   :  { %vm2175_vm13 = vcmp.eq.s32.totalorder %v3474_v45, %v2174_v21 }
0x3391   :  { %v2417_v23 = vsel %vm2175_vm13, 1.0, %v3167_v6 }
0x3392   :  { %2761 = vmatmul.mubr.msk.f32.vlgmr.msra.gmra.mrb[20].mxu0 %vm161_vm1, %v2417_v23 }
0x3465   :  { %v2247_v26 = vpop.f32.mrb[20].mxu0 }
0x3466   :  { %v2256_v27 = vsel %vm2255_vm14, %v772_v25, %v2247_v26  ;;  %v2762_v28 = vpop.f32.mrb[21].mxu0 }
0x3467   :  { %v2257_v30 = vadd.f32 %v2256_v27, %v3432_v4 }
0x3469   :  { %v2420_v32 = vmul.f32 -1.442695, %v2257_v30 }
0x346b   :  { %2998 = vpow2.f32 %v2420_v32 }
0x3475   :  { %v2999_v33 = vpop.eup %2998 }
0x3476   :  { %v2261_v34 = vadd.f32 1.0, %v2999_v33 }
0x3478   :  { %3000 = vrcp.f32 %v2261_v34 }
0x3482   :  { %v3001_v45 = vpop.eup %3000 }
0x3483   :  { %v2264_v6 = vmul.f32 %v3001_v45, %v3440_v22  ;;  %v2271_v38 = vsub.f32 1.0, %v3001_v45  ;;  %v2277_v4 = vmul.f32 %v3001_v45, %v3422_v12 }
0x3485   :  { %2266 = vrot.lane.b32.xlu0 %v2264_v6, %s3168_s26 }
0x34f7   :  { %v2267_v35 = vpop.permute.xlu0 %2266 }
0x34f8   :  { %v2269_v36 = vadd.f32 %v2267_v35, %v2256_v27 }
0x34fa   :  { %3002 = vtanh.f32 %v2269_v36 }
0x3504   :  { %v3003_v37 = vpop.eup %3002 }
0x3505   :  { %2273 = vrot.lane.b32.xlu1 %v3003_v37, %s3169_s4 }
0x3577   :  { %v2274_v40 = vpop.permute.xlu1 %2273 }
0x3578   :  { %v2276_v41 = vmul.f32 %v2274_v40, %v2271_v38 }
0x357a   :  { %v2278_v42 = vadd.f32 %v2277_v4, %v2276_v41 }
0x357c   :  { %2280 = vrot.lane.b32.xlu1 %v2278_v42, %s3169_s4 }
0x35ee   :  { %v2281_v43 = vpop.permute.xlu1 %2280 }
0x35ef   :  { %2772 = vmatmul.mubr.msk.f32.vlgmr.msra.gmra.mrb[20].mxu1 %vm161_vm1, %v2281_v43 }
0x36c2   :  { %v2350_v22 = vpop.f32.mrb[20].mxu1 }
0x36c3   :  { %v2351_v44 = vadd.f32 %v3466_v39, %v2350_v22  ;;  %v2773_v46 = vpop.f32.mrb[21].mxu1 }
0x36c5   :  { %2361 = vst.msk [vmem:[%s3690_s10 + $0x38] sm:$0xff] %vm161_vm1, %v2351_v44 }
0x36c6   :  { %2366 = vsyncpa [#allocation3], 1 }
0x36c7   :  { %2367 = vsyncpa [#allocation7], 1 }
0x36c8   :  { %2368 = vsyncpa [#allocation10], 1 }
0x36c9   :  { %2369 = vsyncpa [#allocation13], 1 }
0x36ca   :  { %2370 = vsyncpa [#allocation4], 1 }

</bundles_post_ra>
